<compile_context>
chip_gen: v6e
topology: v6e:2x2x1
jax: 0.10.0
libtpu: 0.0.40
codegen_flags: <defaults>
</compile_context>

<pallas_src>
import numpy as np

import jax
import jax.numpy as jnp
from jax import lax
from jax.experimental import pallas as pl
from jax.experimental.pallas import tpu as pltpu


# ---------------- Config (deterministic, in-script) ----------------
CHANNELS = 4
CONV_FILTERS = 8
KERNEL_SIZE = 3          # kernel hard-codes 3x3 with padding=1 (as the module uses)
GRID_H = 16
GRID_W = 16
NUM_ACTIONS = 6
HIDDEN = 256
BATCH = 2
LANES = 128              # lane-padded fused head output width

assert KERNEL_SIZE == 3, "fused kernel assumes 3x3 'same' convolutions (padding=1)"
assert GRID_W * CONV_FILTERS == LANES, "conv activation rows are exactly one lane-tile wide"


# ---------------- Fused Pallas kernel (single grid step, whole batch) ----------------
def _fused_kernel(x_ref, m1_ref, b1_ref, m2_ref, b2_ref,
                  wf1_ref, bf1_ref, wh_ref, bh_ref, out_ref):
    """Whole forward for the whole (small) batch in one invocation.

    x_ref   : (B*H, W*Cin) f32    lane-dense NHWC rows (row = b*H + h, col = w*Cin + ci)
    m1/m2   : (3, W*Cin, W*Cout)  banded conv matrices for H-offsets (-1, 0, +1)
    b1/b2   : (1, W*Cout)         conv bias tiled along W
    wf1     : (H*W*F, 256) bf16   rows already permuted NCHW-flat -> NHWC-flat
    bf1     : (1, 256) f32
    wh      : (256, 128) f32      [policy | value | zero-pad] fused, lane-padded head
    bh      : (1, 128) f32
    out_ref : (B, 128) f32        lane-dense fused output (logits in [:A], value at [A])
    """
    H = GRID_H

    def conv3x3_relu(x, m_ref, b_ref):
        # x: (B*H, W*Cin) f32.  H-axis neighbours via sublane shift + zero row;
        # per-image top/bottom rows masked with an iota (handles batch borders too).
        zero_row = jnp.zeros((1, x.shape[1]), x.dtype)
        x_prev = jnp.concatenate([zero_row, x[:-1, :]], axis=0)   # row r -> x[r-1]
        x_next = jnp.concatenate([x[1:, :], zero_row], axis=0)    # row r -> x[r+1]
        rows = lax.broadcasted_iota(jnp.int32, x.shape, 0)
        x_prev = jnp.where(rows % H == 0, 0.0, x_prev)            # h == 0     -> zero pad
        x_next = jnp.where(rows % H == H - 1, 0.0, x_next)        # h == H - 1 -> zero pad
        # W-axis taps + zero padding are folded into the banded matrices: 3 MXU matmuls.
        acc = jnp.dot(x_prev, m_ref[0], preferred_element_type=jnp.float32)
        acc += jnp.dot(x, m_ref[1], preferred_element_type=jnp.float32)
        acc += jnp.dot(x_next, m_ref[2], preferred_element_type=jnp.float32)
        return jnp.maximum(acc + b_ref[...], 0.0)                 # (B*H, W*Cout)

    a1 = conv3x3_relu(x_ref[...], m1_ref, b1_ref)                 # (B*H, W*F) = (32, 128)
    a2 = conv3x3_relu(a1, m2_ref, b2_ref)                         # (32, 128)

    # Flatten to (B, H*W*F); fc1_w rows were permuted once at prep time, so this
    # matches PyTorch's x.view(B, -1) on NCHW exactly.
    B = x_ref.shape[0] // H
    feat = a2.reshape(B, GRID_H * GRID_W * CONV_FILTERS)          # (B, 2048)

    # bf16 x bf16 straight into the MXU (f32 accumulate); no f32 weight copy.
    h = jnp.maximum(
        jnp.dot(feat.astype(jnp.bfloat16), wf1_ref[...],
                preferred_element_type=jnp.float32) + bf1_ref[...], 0.0)   # (B, 256)

    # Fused, lane-padded policy+value head: one matmul, one dense (B,128) store.
    out_ref[...] = jnp.dot(h, wh_ref[...],
                           preferred_element_type=jnp.float32) + bh_ref[...]


# ---------------- Wrapper ----------------
@jax.jit
def cnn_actor_critic_forward(x_nchw, prep):
    B = x_nchw.shape[0]
    H, W, C, F, A = GRID_H, GRID_W, CHANNELS, CONV_FILTERS, NUM_ACTIONS

    # NCHW -> NHWC -> lane-dense (B*H, W*C) rows (channels minor on the lane axis).
    x2 = jnp.transpose(x_nchw, (0, 2, 3, 1)).reshape(B * H, W * C)

    out = pl.pallas_call(
        _fused_kernel,
        grid=(1,),                                                # single fused step
        out_shape=jax.ShapeDtypeStruct((B, LANES), jnp.float32),
        in_specs=[
            pl.BlockSpec((B * H, W * C), lambda i: (0, 0)),       # x rows
            pl.BlockSpec((3, W * C, W * F), lambda i: (0, 0, 0)), # conv1 banded weights
            pl.BlockSpec((1, W * F), lambda i: (0, 0)),           # conv1 bias (tiled)
            pl.BlockSpec((3, W * F, W * F), lambda i: (0, 0, 0)), # conv2 banded weights
            pl.BlockSpec((1, W * F), lambda i: (0, 0)),           # conv2 bias (tiled)
            pl.BlockSpec((H * W * F, HIDDEN), lambda i: (0, 0)),  # fc1_w (bf16)
            pl.BlockSpec((1, HIDDEN), lambda i: (0, 0)),          # fc1_b
            pl.BlockSpec((HIDDEN, LANES), lambda i: (0, 0)),      # fused head_w (lane-padded)
            pl.BlockSpec((1, LANES), lambda i: (0, 0)),           # fused head_b (lane-padded)
        ],
        out_specs=pl.BlockSpec((B, LANES), lambda i: (0, 0)),
        compiler_params=pltpu.CompilerParams(
            dimension_semantics=("arbitrary",),
            vmem_limit_bytes=32 * 1024 * 1024),                   # safe on v5e/v6e/v7x
    )(x2,
      prep["conv1_m"], prep["conv1_b"],
      prep["conv2_m"], prep["conv2_b"],
      prep["fc1_w"], prep["fc1_b"],
      prep["head_w"], prep["head_b"])

    return out[:, :A], out[:, A]          # logits (B, A), value (B,)


# ---------------- Deterministic parameter init + one-time prep ----------------
def init_params(key):
    """PyTorch-style params: conv weights HWIO (kh,kw,Cin,Cout); linear weights (in,out);
    fc1_w rows in PyTorch's NCHW-flat order (c*H*W + h*W + w)."""
    ks = jax.random.split(key, 10)

    def unif(k, shape, fan_in):
        bound = 1.0 / np.sqrt(fan_in)
        return jax.random.uniform(k, shape, jnp.float32, -bound, bound)

    D = CONV_FILTERS * GRID_H * GRID_W
    return {
        "conv1_w": unif(ks[0], (3, 3, CHANNELS, CONV_FILTERS), CHANNELS * 9),
        "conv1_b": unif(ks[1], (CONV_FILTERS,), CHANNELS * 9),
        "conv2_w": unif(ks[2], (3, 3, CONV_FILTERS, CONV_FILTERS), CONV_FILTERS * 9),
        "conv2_b": unif(ks[3], (CONV_FILTERS,), CONV_FILTERS * 9),
        "fc1_w": unif(ks[4], (D, HIDDEN), D),
        "fc1_b": unif(ks[5], (HIDDEN,), D),
        "fcp_w": unif(ks[6], (HIDDEN, NUM_ACTIONS), HIDDEN),
        "fcp_b": unif(ks[7], (NUM_ACTIONS,), HIDDEN),
        "fcv_w": unif(ks[8], (HIDDEN, 1), HIDDEN),
        "fcv_b": unif(ks[9], (1,), HIDDEN),
    }


def _banded_conv_matrices(w_hwio, W):
    """For each H-offset oy in (-1,0,+1), build M_oy of shape (W*Cin, W*Cout) with
       M_oy[(w+ox)*Cin+ci, w*Cout+co] = w[oy+1, ox+1, ci, co]  (taps outside [0,W) omitted),
    so that conv(x)[h, w*Cout+co] = sum_oy (x_row[h+oy] @ M_oy)[w*Cout+co] with zero padding."""
    w = np.asarray(w_hwio)
    _, _, cin, cout = w.shape
    m = np.zeros((3, W * cin, W * cout), np.float32)
    for oy in (-1, 0, 1):
        for wc in range(W):
            for ox in (-1, 0, 1):
                ws = wc + ox
                if 0 <= ws < W:
                    m[oy + 1, ws * cin:(ws + 1) * cin, wc * cout:(wc + 1) * cout] = w[oy + 1, ox + 1]
    return jnp.asarray(m)


def prepare_params(p):
    """One-time prep (apply exactly once):
      - conv weights -> banded (3, W*Cin, W*Cout) matrices; bias tiled along W,
      - fc1_w rows permuted NCHW-flat -> NHWC-flat (folds PyTorch's .view(B,-1)),
        stored bf16 (fed directly to the MXU),
      - policy/value heads concatenated AND zero-padded to 128 lanes (lane-dense output)."""
    F, H, W, C, A = CONV_FILTERS, GRID_H, GRID_W, CHANNELS, NUM_ACTIONS

    fc1_w_nhwc = (p["fc1_w"].reshape(F, H, W, HIDDEN)
                  .transpose(1, 2, 0, 3)
                  .reshape(H * W * F, HIDDEN))

    head_w = jnp.concatenate([p["fcp_w"], p["fcv_w"]], axis=1)            # (256, A+1)
    head_b = jnp.concatenate([p["fcp_b"], p["fcv_b"]])                    # (A+1,)
    head_w_pad = jnp.zeros((HIDDEN, LANES), jnp.float32).at[:, :A + 1].set(head_w)
    head_b_pad = jnp.zeros((1, LANES), jnp.float32).at[0, :A + 1].set(head_b)

    return {
        "conv1_m": _banded_conv_matrices(p["conv1_w"], W),                # (3, W*C, W*F)
        "conv1_b": jnp.tile(p["conv1_b"], W).reshape(1, W * F),
        "conv2_m": _banded_conv_matrices(p["conv2_w"], W),                # (3, W*F, W*F)
        "conv2_b": jnp.tile(p["conv2_b"], W).reshape(1, W * F),
        "fc1_w": fc1_w_nhwc.astype(jnp.bfloat16),
        "fc1_b": p["fc1_b"].reshape(1, HIDDEN),
        "head_w": head_w_pad,
        "head_b": head_b_pad,
    }


# ---------------- Pure-JAX reference (PyTorch semantics) ----------------
@jax.jit
def reference_forward(x_nchw, p):
    x = jnp.transpose(x_nchw, (0, 2, 3, 1))

    def conv(x, w, b):
        y = lax.conv_general_dilated(x, w, (1, 1), ((1, 1), (1, 1)),
                                     dimension_numbers=("NHWC", "HWIO", "NHWC"))
        return jnp.maximum(y + b.reshape(1, 1, 1, -1), 0.0)

    x = conv(x, p["conv1_w"], p["conv1_b"])
    x = conv(x, p["conv2_w"], p["conv2_b"])
    feat = jnp.transpose(x, (0, 3, 1, 2)).reshape(x.shape[0], -1)   # NCHW flatten (PyTorch)
    h = jnp.maximum(feat @ p["fc1_w"] + p["fc1_b"], 0.0)
    logits = h @ p["fcp_w"] + p["fcp_b"]
    value = (h @ p["fcv_w"] + p["fcv_b"])[:, 0]
    return logits, value


if __name__ == "__main__":
    key = jax.random.PRNGKey(0)
    k_x, k_p = jax.random.split(key)
    x = jax.random.normal(k_x, (BATCH, CHANNELS, GRID_H, GRID_W), jnp.float32)

    params = init_params(k_p)
    prep = prepare_params(params)

    logits, value = cnn_actor_critic_forward(x, prep)
    jax.block_until_ready((logits, value))
    assert logits.shape == (BATCH, NUM_ACTIONS)
    assert value.shape == (BATCH,)

    # Numerical check vs. a pure-JAX reference with the original (f32, NCHW-flatten)
    # semantics; tolerance is loose only because the fc1 matmul runs in bf16.
    ref_logits, ref_value = reference_forward(x, params)
    np.testing.assert_allclose(np.asarray(logits), np.asarray(ref_logits), rtol=2e-2, atol=2e-2)
    np.testing.assert_allclose(np.asarray(value), np.asarray(ref_value), rtol=2e-2, atol=2e-2)

    print("KERNEL_OK")
</pallas_src>

<mosaic_0001>
module attributes {stable_mosaic.version = 11 : i64} {
  func.func @_fused_kernel(%arg0: i32, %arg1: memref<32x64xf32, #tpu.memory_space<vmem>>, %arg2: memref<3x64x128xf32, #tpu.memory_space<vmem>>, %arg3: memref<1x128xf32, #tpu.memory_space<vmem>>, %arg4: memref<3x128x128xf32, #tpu.memory_space<vmem>>, %arg5: memref<1x128xf32, #tpu.memory_space<vmem>>, %arg6: memref<2048x256xbf16, #tpu.memory_space<vmem>>, %arg7: memref<1x256xf32, #tpu.memory_space<vmem>>, %arg8: memref<256x128xf32, #tpu.memory_space<vmem>>, %arg9: memref<1x128xf32, #tpu.memory_space<vmem>>, %arg10: memref<2x128xf32, #tpu.memory_space<vmem>>) attributes {dimension_semantics = [#tpu.dimension_semantics<arbitrary>], iteration_bounds = array<i64: 1>, scalar_prefetch = 0 : i64, scratch_operands = 0 : i64, tpu.core_type = #tpu.core_type<tc>, window_params = [{pipeline_mode = #tpu.pipeline_mode<synchronous>, transform_indices = @transform_0, window_bounds = array<i64: 32, 64>}, {pipeline_mode = #tpu.pipeline_mode<synchronous>, transform_indices = @transform_1, window_bounds = array<i64: 3, 64, 128>}, {pipeline_mode = #tpu.pipeline_mode<synchronous>, transform_indices = @transform_2, window_bounds = array<i64: 1, 128>}, {pipeline_mode = #tpu.pipeline_mode<synchronous>, transform_indices = @transform_3, window_bounds = array<i64: 3, 128, 128>}, {pipeline_mode = #tpu.pipeline_mode<synchronous>, transform_indices = @transform_4, window_bounds = array<i64: 1, 128>}, {pipeline_mode = #tpu.pipeline_mode<synchronous>, transform_indices = @transform_5, window_bounds = array<i64: 2048, 256>}, {pipeline_mode = #tpu.pipeline_mode<synchronous>, transform_indices = @transform_6, window_bounds = array<i64: 1, 256>}, {pipeline_mode = #tpu.pipeline_mode<synchronous>, transform_indices = @transform_7, window_bounds = array<i64: 256, 128>}, {pipeline_mode = #tpu.pipeline_mode<synchronous>, transform_indices = @transform_8, window_bounds = array<i64: 1, 128>}, {pipeline_mode = #tpu.pipeline_mode<synchronous>, transform_indices = @transform_9, window_bounds = array<i64: 2, 128>}]} {
    %c0 = arith.constant 0 : index
    %c0_0 = arith.constant 0 : index
    %0 = vector.load %arg1[%c0, %c0_0] : memref<32x64xf32, #tpu.memory_space<vmem>>, vector<32x64xf32>
    %cst = arith.constant 0.000000e+00 : f32
    %1 = vector.broadcast %cst : f32 to vector<1x64xf32>
    %2 = vector.extract_strided_slice %0 {offsets = [0, 0], sizes = [31, 64], strides = [1, 1]} : vector<32x64xf32> to vector<31x64xf32>
    %3 = tpu.concatenate %1, %2 in 0 : vector<1x64xf32>, vector<31x64xf32> -> vector<32x64xf32>
    %4 = vector.extract_strided_slice %0 {offsets = [1, 0], sizes = [31, 64], strides = [1, 1]} : vector<32x64xf32> to vector<31x64xf32>
    %5 = tpu.concatenate %4, %1 in 0 : vector<31x64xf32>, vector<1x64xf32> -> vector<32x64xf32>
    %6 = tpu.iota {dimensions = array<i32: 0>} : vector<32x64xi32>
    %c16_i32 = arith.constant 16 : i32
    %c0_i32 = arith.constant 0 : i32
    %7 = arith.cmpi eq, %c16_i32, %c0_i32 : i32
    %c1_i32 = arith.constant 1 : i32
    %8 = arith.select %7, %c1_i32, %c16_i32 : i32
    %9 = vector.broadcast %8 : i32 to vector<32x64xi32>
    %10 = arith.remsi %6, %9 : vector<32x64xi32>
    %c0_i32_1 = arith.constant 0 : i32
    %11 = vector.broadcast %c0_i32_1 : i32 to vector<32x64xi32>
    %12 = arith.cmpi ne, %10, %11 : vector<32x64xi32>
    %c0_i32_2 = arith.constant 0 : i32
    %13 = vector.broadcast %c0_i32_2 : i32 to vector<32x64xi32>
    %14 = arith.cmpi slt, %10, %13 : vector<32x64xi32>
    %c0_i32_3 = arith.constant 0 : i32
    %15 = arith.cmpi slt, %8, %c0_i32_3 : i32
    %16 = vector.broadcast %15 : i1 to vector<32x64xi1>
    %17 = vector.broadcast %16 : vector<32x64xi1> to vector<32x64xi1>
    %18 = arith.xori %14, %17 : vector<32x64xi1>
    %19 = arith.andi %18, %12 : vector<32x64xi1>
    %20 = vector.broadcast %8 : i32 to vector<32x64xi32>
    %21 = arith.addi %10, %20 : vector<32x64xi32>
    %22 = arith.select %19, %21, %10 : vector<32x64xi1>, vector<32x64xi32>
    %c0_i32_4 = arith.constant 0 : i32
    %23 = vector.broadcast %c0_i32_4 : i32 to vector<32x64xi32>
    %24 = arith.cmpi eq, %22, %23 : vector<32x64xi32>
    %cst_5 = arith.constant 0.000000e+00 : f32
    %25 = vector.broadcast %cst_5 : f32 to vector<32x64xf32>
    %26 = arith.select %24, %25, %3 : vector<32x64xi1>, vector<32x64xf32>
    %c16_i32_6 = arith.constant 16 : i32
    %c0_i32_7 = arith.constant 0 : i32
    %27 = arith.cmpi eq, %c16_i32_6, %c0_i32_7 : i32
    %c1_i32_8 = arith.constant 1 : i32
    %28 = arith.select %27, %c1_i32_8, %c16_i32_6 : i32
    %29 = vector.broadcast %28 : i32 to vector<32x64xi32>
    %30 = arith.remsi %6, %29 : vector<32x64xi32>
    %c0_i32_9 = arith.constant 0 : i32
    %31 = vector.broadcast %c0_i32_9 : i32 to vector<32x64xi32>
    %32 = arith.cmpi ne, %30, %31 : vector<32x64xi32>
    %c0_i32_10 = arith.constant 0 : i32
    %33 = vector.broadcast %c0_i32_10 : i32 to vector<32x64xi32>
    %34 = arith.cmpi slt, %30, %33 : vector<32x64xi32>
    %c0_i32_11 = arith.constant 0 : i32
    %35 = arith.cmpi slt, %28, %c0_i32_11 : i32
    %36 = vector.broadcast %35 : i1 to vector<32x64xi1>
    %37 = vector.broadcast %36 : vector<32x64xi1> to vector<32x64xi1>
    %38 = arith.xori %34, %37 : vector<32x64xi1>
    %39 = arith.andi %38, %32 : vector<32x64xi1>
    %40 = vector.broadcast %28 : i32 to vector<32x64xi32>
    %41 = arith.addi %30, %40 : vector<32x64xi32>
    %42 = arith.select %39, %41, %30 : vector<32x64xi1>, vector<32x64xi32>
    %c15_i32 = arith.constant 15 : i32
    %43 = vector.broadcast %c15_i32 : i32 to vector<32x64xi32>
    %44 = arith.cmpi eq, %42, %43 : vector<32x64xi32>
    %cst_12 = arith.constant 0.000000e+00 : f32
    %45 = vector.broadcast %cst_12 : f32 to vector<32x64xf32>
    %46 = arith.select %44, %45, %5 : vector<32x64xi1>, vector<32x64xf32>
    %c0_13 = arith.constant 0 : index
    %c0_14 = arith.constant 0 : index
    %c0_15 = arith.constant 0 : index
    %47 = vector.load %arg2[%c0_13, %c0_14, %c0_15] : memref<3x64x128xf32, #tpu.memory_space<vmem>>, vector<1x64x128xf32>
    %48 = vector.shape_cast %47 : vector<1x64x128xf32> to vector<64x128xf32>
    %cst_16 = arith.constant dense<0.000000e+00> : vector<32x128xf32>
    %49 = tpu.matmul %26, %48, %cst_16 {dimension_numbers = #tpu.dot_dimension_numbers<[1], [0], [0], [1], [0, 0, 1, 1], [], []>} : vector<32x64xf32>, vector<64x128xf32>, vector<32x128xf32> -> vector<32x128xf32>
    %c1 = arith.constant 1 : index
    %c0_17 = arith.constant 0 : index
    %c0_18 = arith.constant 0 : index
    %50 = vector.load %arg2[%c1, %c0_17, %c0_18] : memref<3x64x128xf32, #tpu.memory_space<vmem>>, vector<1x64x128xf32>
    %51 = vector.shape_cast %50 : vector<1x64x128xf32> to vector<64x128xf32>
    %cst_19 = arith.constant dense<0.000000e+00> : vector<32x128xf32>
    %52 = tpu.matmul %0, %51, %cst_19 {dimension_numbers = #tpu.dot_dimension_numbers<[1], [0], [0], [1], [0, 0, 1, 1], [], []>} : vector<32x64xf32>, vector<64x128xf32>, vector<32x128xf32> -> vector<32x128xf32>
    %53 = arith.addf %49, %52 : vector<32x128xf32>
    %c2 = arith.constant 2 : index
    %c0_20 = arith.constant 0 : index
    %c0_21 = arith.constant 0 : index
    %54 = vector.load %arg2[%c2, %c0_20, %c0_21] : memref<3x64x128xf32, #tpu.memory_space<vmem>>, vector<1x64x128xf32>
    %55 = vector.shape_cast %54 : vector<1x64x128xf32> to vector<64x128xf32>
    %cst_22 = arith.constant dense<0.000000e+00> : vector<32x128xf32>
    %56 = tpu.matmul %46, %55, %cst_22 {dimension_numbers = #tpu.dot_dimension_numbers<[1], [0], [0], [1], [0, 0, 1, 1], [], []>} : vector<32x64xf32>, vector<64x128xf32>, vector<32x128xf32> -> vector<32x128xf32>
    %57 = arith.addf %53, %56 : vector<32x128xf32>
    %c0_23 = arith.constant 0 : index
    %c0_24 = arith.constant 0 : index
    %58 = vector.load %arg3[%c0_23, %c0_24] : memref<1x128xf32, #tpu.memory_space<vmem>>, vector<1x128xf32>
    %59 = vector.broadcast %58 : vector<1x128xf32> to vector<32x128xf32>
    %60 = arith.addf %57, %59 : vector<32x128xf32>
    %cst_25 = arith.constant 0.000000e+00 : f32
    %61 = vector.broadcast %cst_25 : f32 to vector<32x128xf32>
    %62 = arith.maximumf %60, %61 : vector<32x128xf32>
    %cst_26 = arith.constant 0.000000e+00 : f32
    %63 = vector.broadcast %cst_26 : f32 to vector<1x128xf32>
    %64 = vector.extract_strided_slice %62 {offsets = [0, 0], sizes = [31, 128], strides = [1, 1]} : vector<32x128xf32> to vector<31x128xf32>
    %65 = tpu.concatenate %63, %64 in 0 : vector<1x128xf32>, vector<31x128xf32> -> vector<32x128xf32>
    %66 = vector.extract_strided_slice %62 {offsets = [1, 0], sizes = [31, 128], strides = [1, 1]} : vector<32x128xf32> to vector<31x128xf32>
    %67 = tpu.concatenate %66, %63 in 0 : vector<31x128xf32>, vector<1x128xf32> -> vector<32x128xf32>
    %68 = tpu.iota {dimensions = array<i32: 0>} : vector<32x128xi32>
    %c16_i32_27 = arith.constant 16 : i32
    %c0_i32_28 = arith.constant 0 : i32
    %69 = arith.cmpi eq, %c16_i32_27, %c0_i32_28 : i32
    %c1_i32_29 = arith.constant 1 : i32
    %70 = arith.select %69, %c1_i32_29, %c16_i32_27 : i32
    %71 = vector.broadcast %70 : i32 to vector<32x128xi32>
    %72 = arith.remsi %68, %71 : vector<32x128xi32>
    %c0_i32_30 = arith.constant 0 : i32
    %73 = vector.broadcast %c0_i32_30 : i32 to vector<32x128xi32>
    %74 = arith.cmpi ne, %72, %73 : vector<32x128xi32>
    %c0_i32_31 = arith.constant 0 : i32
    %75 = vector.broadcast %c0_i32_31 : i32 to vector<32x128xi32>
    %76 = arith.cmpi slt, %72, %75 : vector<32x128xi32>
    %c0_i32_32 = arith.constant 0 : i32
    %77 = arith.cmpi slt, %70, %c0_i32_32 : i32
    %78 = vector.broadcast %77 : i1 to vector<32x128xi1>
    %79 = vector.broadcast %78 : vector<32x128xi1> to vector<32x128xi1>
    %80 = arith.xori %76, %79 : vector<32x128xi1>
    %81 = arith.andi %80, %74 : vector<32x128xi1>
    %82 = vector.broadcast %70 : i32 to vector<32x128xi32>
    %83 = arith.addi %72, %82 : vector<32x128xi32>
    %84 = arith.select %81, %83, %72 : vector<32x128xi1>, vector<32x128xi32>
    %c0_i32_33 = arith.constant 0 : i32
    %85 = vector.broadcast %c0_i32_33 : i32 to vector<32x128xi32>
    %86 = arith.cmpi eq, %84, %85 : vector<32x128xi32>
    %cst_34 = arith.constant 0.000000e+00 : f32
    %87 = vector.broadcast %cst_34 : f32 to vector<32x128xf32>
    %88 = arith.select %86, %87, %65 : vector<32x128xi1>, vector<32x128xf32>
    %c16_i32_35 = arith.constant 16 : i32
    %c0_i32_36 = arith.constant 0 : i32
    %89 = arith.cmpi eq, %c16_i32_35, %c0_i32_36 : i32
    %c1_i32_37 = arith.constant 1 : i32
    %90 = arith.select %89, %c1_i32_37, %c16_i32_35 : i32
    %91 = vector.broadcast %90 : i32 to vector<32x128xi32>
    %92 = arith.remsi %68, %91 : vector<32x128xi32>
    %c0_i32_38 = arith.constant 0 : i32
    %93 = vector.broadcast %c0_i32_38 : i32 to vector<32x128xi32>
    %94 = arith.cmpi ne, %92, %93 : vector<32x128xi32>
    %c0_i32_39 = arith.constant 0 : i32
    %95 = vector.broadcast %c0_i32_39 : i32 to vector<32x128xi32>
    %96 = arith.cmpi slt, %92, %95 : vector<32x128xi32>
    %c0_i32_40 = arith.constant 0 : i32
    %97 = arith.cmpi slt, %90, %c0_i32_40 : i32
    %98 = vector.broadcast %97 : i1 to vector<32x128xi1>
    %99 = vector.broadcast %98 : vector<32x128xi1> to vector<32x128xi1>
    %100 = arith.xori %96, %99 : vector<32x128xi1>
    %101 = arith.andi %100, %94 : vector<32x128xi1>
    %102 = vector.broadcast %90 : i32 to vector<32x128xi32>
    %103 = arith.addi %92, %102 : vector<32x128xi32>
    %104 = arith.select %101, %103, %92 : vector<32x128xi1>, vector<32x128xi32>
    %c15_i32_41 = arith.constant 15 : i32
    %105 = vector.broadcast %c15_i32_41 : i32 to vector<32x128xi32>
    %106 = arith.cmpi eq, %104, %105 : vector<32x128xi32>
    %cst_42 = arith.constant 0.000000e+00 : f32
    %107 = vector.broadcast %cst_42 : f32 to vector<32x128xf32>
    %108 = arith.select %106, %107, %67 : vector<32x128xi1>, vector<32x128xf32>
    %c0_43 = arith.constant 0 : index
    %c0_44 = arith.constant 0 : index
    %c0_45 = arith.constant 0 : index
    %109 = vector.load %arg4[%c0_43, %c0_44, %c0_45] : memref<3x128x128xf32, #tpu.memory_space<vmem>>, vector<1x128x128xf32>
    %110 = vector.shape_cast %109 : vector<1x128x128xf32> to vector<128x128xf32>
    %cst_46 = arith.constant dense<0.000000e+00> : vector<32x128xf32>
    %111 = tpu.matmul %88, %110, %cst_46 {dimension_numbers = #tpu.dot_dimension_numbers<[1], [0], [0], [1], [0, 0, 1, 1], [], []>} : vector<32x128xf32>, vector<128x128xf32>, vector<32x128xf32> -> vector<32x128xf32>
    %c1_47 = arith.constant 1 : index
    %c0_48 = arith.constant 0 : index
    %c0_49 = arith.constant 0 : index
    %112 = vector.load %arg4[%c1_47, %c0_48, %c0_49] : memref<3x128x128xf32, #tpu.memory_space<vmem>>, vector<1x128x128xf32>
    %113 = vector.shape_cast %112 : vector<1x128x128xf32> to vector<128x128xf32>
    %cst_50 = arith.constant dense<0.000000e+00> : vector<32x128xf32>
    %114 = tpu.matmul %62, %113, %cst_50 {dimension_numbers = #tpu.dot_dimension_numbers<[1], [0], [0], [1], [0, 0, 1, 1], [], []>} : vector<32x128xf32>, vector<128x128xf32>, vector<32x128xf32> -> vector<32x128xf32>
    %115 = arith.addf %111, %114 : vector<32x128xf32>
    %c2_51 = arith.constant 2 : index
    %c0_52 = arith.constant 0 : index
    %c0_53 = arith.constant 0 : index
    %116 = vector.load %arg4[%c2_51, %c0_52, %c0_53] : memref<3x128x128xf32, #tpu.memory_space<vmem>>, vector<1x128x128xf32>
    %117 = vector.shape_cast %116 : vector<1x128x128xf32> to vector<128x128xf32>
    %cst_54 = arith.constant dense<0.000000e+00> : vector<32x128xf32>
    %118 = tpu.matmul %108, %117, %cst_54 {dimension_numbers = #tpu.dot_dimension_numbers<[1], [0], [0], [1], [0, 0, 1, 1], [], []>} : vector<32x128xf32>, vector<128x128xf32>, vector<32x128xf32> -> vector<32x128xf32>
    %119 = arith.addf %115, %118 : vector<32x128xf32>
    %c0_55 = arith.constant 0 : index
    %c0_56 = arith.constant 0 : index
    %120 = vector.load %arg5[%c0_55, %c0_56] : memref<1x128xf32, #tpu.memory_space<vmem>>, vector<1x128xf32>
    %121 = vector.broadcast %120 : vector<1x128xf32> to vector<32x128xf32>
    %122 = arith.addf %119, %121 : vector<32x128xf32>
    %cst_57 = arith.constant 0.000000e+00 : f32
    %123 = vector.broadcast %cst_57 : f32 to vector<32x128xf32>
    %124 = arith.maximumf %122, %123 : vector<32x128xf32>
    %125 = vector.shape_cast %124 : vector<32x128xf32> to vector<2x2048xf32>
    %126 = arith.truncf %125 : vector<2x2048xf32> to vector<2x2048xbf16>
    %c0_58 = arith.constant 0 : index
    %c0_59 = arith.constant 0 : index
    %127 = vector.load %arg6[%c0_58, %c0_59] : memref<2048x256xbf16, #tpu.memory_space<vmem>>, vector<2048x256xbf16>
    %cst_60 = arith.constant dense<0.000000e+00> : vector<2x256xf32>
    %128 = tpu.matmul %126, %127, %cst_60 {dimension_numbers = #tpu.dot_dimension_numbers<[1], [0], [0], [1], [0, 0, 1, 1], [], []>} : vector<2x2048xbf16>, vector<2048x256xbf16>, vector<2x256xf32> -> vector<2x256xf32>
    %c0_61 = arith.constant 0 : index
    %c0_62 = arith.constant 0 : index
    %129 = vector.load %arg7[%c0_61, %c0_62] : memref<1x256xf32, #tpu.memory_space<vmem>>, vector<1x256xf32>
    %130 = vector.broadcast %129 : vector<1x256xf32> to vector<2x256xf32>
    %131 = arith.addf %128, %130 : vector<2x256xf32>
    %cst_63 = arith.constant 0.000000e+00 : f32
    %132 = vector.broadcast %cst_63 : f32 to vector<2x256xf32>
    %133 = arith.maximumf %131, %132 : vector<2x256xf32>
    %c0_64 = arith.constant 0 : index
    %c0_65 = arith.constant 0 : index
    %134 = vector.load %arg8[%c0_64, %c0_65] : memref<256x128xf32, #tpu.memory_space<vmem>>, vector<256x128xf32>
    %cst_66 = arith.constant dense<0.000000e+00> : vector<2x128xf32>
    %135 = tpu.matmul %133, %134, %cst_66 {dimension_numbers = #tpu.dot_dimension_numbers<[1], [0], [0], [1], [0, 0, 1, 1], [], []>} : vector<2x256xf32>, vector<256x128xf32>, vector<2x128xf32> -> vector<2x128xf32>
    %c0_67 = arith.constant 0 : index
    %c0_68 = arith.constant 0 : index
    %136 = vector.load %arg9[%c0_67, %c0_68] : memref<1x128xf32, #tpu.memory_space<vmem>>, vector<1x128xf32>
    %137 = vector.broadcast %136 : vector<1x128xf32> to vector<2x128xf32>
    %138 = arith.addf %135, %137 : vector<2x128xf32>
    %c0_69 = arith.constant 0 : index
    %c0_70 = arith.constant 0 : index
    %139 = vector.load %arg10[%c0_69, %c0_70] : memref<2x128xf32, #tpu.memory_space<vmem>>, vector<2x128xf32>
    tpu.vector_store %arg10[%c0_69, %c0_70], %138 {strides = array<i32>} : memref<2x128xf32, #tpu.memory_space<vmem>>, vector<2x128xf32>,
    return
  }
  func.func @transform_0(%arg0: i32) -> (i32, i32) {
    %c0_i32 = arith.constant 0 : i32
    %c0_i32_0 = arith.constant 0 : i32
    %c0_i32_1 = arith.constant 0 : i32
    return %c0_i32, %c0_i32_0 : i32, i32
  }
  func.func @transform_1(%arg0: i32) -> (i32, i32, i32) {
    %c0_i32 = arith.constant 0 : i32
    %c0_i32_0 = arith.constant 0 : i32
    %c0_i32_1 = arith.constant 0 : i32
    %c0_i32_2 = arith.constant 0 : i32
    return %c0_i32, %c0_i32_0, %c0_i32_1 : i32, i32, i32
  }
  func.func @transform_2(%arg0: i32) -> (i32, i32) {
    %c0_i32 = arith.constant 0 : i32
    %c0_i32_0 = arith.constant 0 : i32
    %c0_i32_1 = arith.constant 0 : i32
    return %c0_i32, %c0_i32_0 : i32, i32
  }
  func.func @transform_3(%arg0: i32) -> (i32, i32, i32) {
    %c0_i32 = arith.constant 0 : i32
    %c0_i32_0 = arith.constant 0 : i32
    %c0_i32_1 = arith.constant 0 : i32
    %c0_i32_2 = arith.constant 0 : i32
    return %c0_i32, %c0_i32_0, %c0_i32_1 : i32, i32, i32
  }
  func.func @transform_4(%arg0: i32) -> (i32, i32) {
    %c0_i32 = arith.constant 0 : i32
    %c0_i32_0 = arith.constant 0 : i32
    %c0_i32_1 = arith.constant 0 : i32
    return %c0_i32, %c0_i32_0 : i32, i32
  }
  func.func @transform_5(%arg0: i32) -> (i32, i32) {
    %c0_i32 = arith.constant 0 : i32
    %c0_i32_0 = arith.constant 0 : i32
    %c0_i32_1 = arith.constant 0 : i32
    return %c0_i32, %c0_i32_0 : i32, i32
  }
  func.func @transform_6(%arg0: i32) -> (i32, i32) {
    %c0_i32 = arith.constant 0 : i32
    %c0_i32_0 = arith.constant 0 : i32
    %c0_i32_1 = arith.constant 0 : i32
    return %c0_i32, %c0_i32_0 : i32, i32
  }
  func.func @transform_7(%arg0: i32) -> (i32, i32) {
    %c0_i32 = arith.constant 0 : i32
    %c0_i32_0 = arith.constant 0 : i32
    %c0_i32_1 = arith.constant 0 : i32
    return %c0_i32, %c0_i32_0 : i32, i32
  }
  func.func @transform_8(%arg0: i32) -> (i32, i32) {
    %c0_i32 = arith.constant 0 : i32
    %c0_i32_0 = arith.constant 0 : i32
    %c0_i32_1 = arith.constant 0 : i32
    return %c0_i32, %c0_i32_0 : i32, i32
  }
  func.func @transform_9(%arg0: i32) -> (i32, i32) {
    %c0_i32 = arith.constant 0 : i32
    %c0_i32_0 = arith.constant 0 : i32
    %c0_i32_1 = arith.constant 0 : i32
    return %c0_i32, %c0_i32_0 : i32, i32
  }
}

</mosaic_0001>

<bundles_post_ra>
// kernel: cnn_actor_critic_forward.1
= control target key start
LH: loop header
LB: loop body
LE: loop exit
PB: predicated region body
PF: predicated region fallthrough
CT: control target
= control target key end

     0   :  { %14 = vsyncpa [#allocation3], 0  ;;  %s4449_s0 = inlined_call_operand.vmem [shape: f32[32,64], index: 0, kind: input, shape index: {}]   ;;  %s4450_s1 = inlined_call_operand.hbm [shape: f32[3,64,128], index: 1, kind: input, shape index: {}]   ;;  %s4451_s2 = inlined_call_operand.vmem [shape: f32[1,128], index: 2, kind: input, shape index: {}]   ;;  %s4452_s3 = inlined_call_operand.vmem [shape: f32[3,128,128], index: 3, kind: input, shape index: {}]   ;;  %s4453_s4 = inlined_call_operand.vmem [shape: f32[1,128], index: 4, kind: input, shape index: {}]   ;;  %s4454_s5 = inlined_call_operand.hbm [shape: bf16[2048,256], index: 5, kind: input, shape index: {}]   ;;  %s4455_s6 = inlined_call_operand.vmem [shape: f32[1,256], index: 6, kind: input, shape index: {}]   ;;  %s4456_s7 = inlined_call_operand.hbm [shape: f32[256,128], index: 7, kind: input, shape index: {}]   ;;  %s4457_s8 = inlined_call_operand.vmem [shape: f32[1,128], index: 8, kind: input, shape index: {}]   ;;  %s4458_s9 = inlined_call_operand.vmem [shape: f32[2,128], index: 9, kind: output, shape index: {}]  }
   0x1   :  { %15 = vsyncpa [#allocation5], 0  ;;  %s4075_s30 = smov [#allocation4]   ;;  %s4076_s11 = smov [#allocation2]  }
   0x2   :  { %s41_s10 = sshll.u32 %s4075_s30, 4  ;;  %s23_s12 = sshll.u32 %s4076_s11, 4  ;;  %s42_s10 = int_to_ptr.vmem [resolvable:$true] %s41_s10  ;;  %s24_s12 = int_to_ptr.vmem [resolvable:$true] %s23_s12 }
   0x3   :  { %s4019_s13 = scalar_lea.vmem %s42_s10, 32768  ;;  %p4024_p1 = scmp.lt.s32.totalorder %s42_s10, %s42_s10 }
   0x4   :  { %p4020_p0 = scmp.ne.s32.totalorder %s42_s10, %s4019_s13  ;;  %p4025_p2 = scmp.lt.s32.totalorder %s4019_s13, %s4019_s13 }
   0x6   :  { %p4026_p3 = por %p4025_p2, %p4024_p1 }
   0x8   :  { %p4027_p4 = pnand %p4026_p3, %p4020_p0 }
   0xa   :  { %4030 = shalt.err (!%p4027_p4)
}
   0xb   :  { %s4077_s14 = smov 128   ;;  %s4078_s15 = smov 8  }
   0xc   :  { %47 = dma.hbm_to_vmem [thread:$0]  %s4454_s5, 32768, %s42_s10, [#allocation5], %s4077_s14, %s4077_s14, %s4078_s15  }
   0xd   :  { %s4039_s18 = scalar_lea.vmem %s24_s12, 3072  ;;  %p4044_p6 = scmp.lt.s32.totalorder %s24_s12, %s24_s12 }
   0xe   :  { %p4040_p5 = scmp.ne.s32.totalorder %s24_s12, %s4039_s18  ;;  %p4045_p7 = scmp.lt.s32.totalorder %s4039_s18, %s4039_s18 }
  0x10   :  { %p4046_p8 = por %p4045_p7, %p4044_p6 }
  0x12   :  { %p4047_p9 = pnand %p4046_p8, %p4040_p5 }
  0x14   :  { %4050 = shalt.err (!%p4047_p9)
}
  0x15   :  { %29 = dma.hbm_to_vmem [thread:$0]  %s4450_s1, 3072, %s24_s12, [#allocation3], %s4077_s14, %s4077_s14, %s4078_s15  }
  0x16   :  { %s4079_s21 = smov [#allocation6]  }
  0x17   :  { %s55_s22 = sshll.u32 %s4079_s21, 4  ;;  %s56_s22 = int_to_ptr.vmem [resolvable:$true] %s55_s22 }
  0x18   :  { %s4059_s23 = scalar_lea.vmem %s56_s22, 4096  ;;  %p4064_p11 = scmp.lt.s32.totalorder %s56_s22, %s56_s22 }
  0x19   :  { %p4060_p10 = scmp.ne.s32.totalorder %s56_s22, %s4059_s23  ;;  %p4065_p12 = scmp.lt.s32.totalorder %s4059_s23, %s4059_s23 }
  0x1b   :  { %p4066_p13 = por %p4065_p12, %p4064_p11 }
  0x1d   :  { %p4067_p0 = pnand %p4066_p13, %p4060_p10 }
  0x1f   :  { %4070 = shalt.err (!%p4067_p0)
}
  0x20   :  { %61 = dma.hbm_to_vmem [thread:$0]  %s4456_s7, 4096, %s56_s22, [#allocation5], %s4077_s14, %s4077_s14, %s4078_s15  }
  0x21   :  { %4071 = dma.done.wait [#allocation3], 3072  }
  0x22   :  { %4072 = vsyncadd [#allocation3], 4294964224 }
  0x23   :  { %4073 = dma.done.wait [#allocation5], 36864  }
  0x24   :  { %4074 = vsyncadd [#allocation5], 4294930432  ;;  %v107_v0 = vlaneseq  ;;  %v192_v1 = vld [vmem:[#allocation2 + $0x78] sm:$0xff]  ;;  %v191_v3 = vld [vmem:[#allocation2 + $0x70] sm:$0xff]  ;;  %vm81_vm0 = vcmask 1040384   ;;  %vm193_vm2 = vcmask 523264  }
  0x25   :  { %v183_v2 = vld [vmem:[#allocation2 + $0x38] sm:$0xff]  ;;  %3441 = vmatprep.subr.mxu0 %v192_v1  ;;  %v182_v4 = vld [vmem:[#allocation2 + $0x30] sm:$0xff]  ;;  %v190_v5 = vld [vmem:[#allocation2 + $0x68] sm:$0xff]  ;;  %vm94_vm4 = vcmask 1046528  }
  0x26   :  { %3463 = vmatprep.subr.mxu1 %v183_v2  ;;  %3442 = vmatpush3.msra.mxu0 %v192_v1  ;;  %v181_v6 = vld [vmem:[#allocation2 + $0x28] sm:$0xff]  ;;  %v4140_v7 = vshrl.u32 %v107_v0, 7  ;;  %v189_v8 = vld [vmem:[#allocation2 + $0x60] sm:$0xff]  ;;  %v188_v11 = vld [vmem:[#allocation2 + $0x58] sm:$0xff] }
  0x27   :  { %3464 = vmatpush3.msra.mxu1 %v183_v2  ;;  %3443 = vmatprep.subr.mxu0 %v191_v3  ;;  %v180_v9 = vld [vmem:[#allocation2 + $0x20] sm:$0xff]  ;;  %v179_v12 = vld [vmem:[#allocation2 + $0x18] sm:$0xff]  ;;  %v187_v14 = vld [vmem:[#allocation2 + $0x50] sm:$0xff] }
  0x28   :  { %3465 = vmatprep.subr.mxu1 %v182_v4  ;;  %3444 = vmatpush3.msra.mxu0 %v191_v3  ;;  %v4145_v10 = vld [vmem:[%s4449_s0] sm:$0xff]  ;;  %v110_v13 = vadd.s32 16, %v4140_v7  ;;  %v116_v16 = vand.u32 15, %v4140_v7  ;;  %v178_v17 = vld [vmem:[#allocation2 + $0x10] sm:$0xff]  ;;  %v4153_v18 = vld [vmem:[%s4449_s0 + $0x8] sm:$0xff]  ;;  %v109_v45 = vadd.s32 8, %v4140_v7 }
  0x29   :  { %3466 = vmatpush3.msra.mxu1 %v182_v4  ;;  %3445 = vmatprep.subr.mxu0 %v190_v5  ;;  %v82_v15 = vrot.slane %v4145_v10, 7  ;;  %v4158_v19 = vld [vmem:[%s4449_s0 + $0x10] sm:$0xff]  ;;  %v186_v20 = vld [vmem:[#allocation2 + $0x48] sm:$0xff]  ;;  %v185_v22 = vld [vmem:[#allocation2 + $0x40] sm:$0xff]  ;;  %v83_v28 = vrot.slane %v4153_v18, 7  ;;  %v95_v38 = vrot.slane %v4145_v10, 1 }
  0x2a   :  { %3467 = vmatprep.subr.mxu1 %v181_v6  ;;  %3446 = vmatpush3.msra.mxu0 %v190_v5  ;;  %v177_v21 = vld [vmem:[#allocation2 + $0x8] sm:$0xff]  ;;  %v85_v23 = vrot.slane %v4158_v19, 7  ;;  %v130_v24 = vand.u32 15, %v110_v13  ;;  %v176_v25 = vld [vmem:[#allocation2] sm:$0xff]  ;;  %vm4162_vm1 = vcmp.eq.s32.totalorder %v116_v16, 0  ;;  %v4170_v29 = vld [vmem:[%s4449_s0 + $0x18] sm:$0xff] }
  0x2b   :  { %3468 = vmatpush3.msra.mxu1 %v181_v6  ;;  %3447 = vmatprep.subr.mxu0 %v189_v8  ;;  %v93_v26 = vsel %vm81_vm0, 0.0, %v82_v15  ;;  %v392_v31 = vld [vmem:[#allocation2 + $0xb8] sm:$0xff]  ;;  %v84_v34 = vsel %vm81_vm0, %v82_v15, %v83_v28  ;;  %v87_v35 = vrot.slane %v4170_v29, 7  ;;  %v391_v36 = vld [vmem:[#allocation2 + $0xb0] sm:$0xff]  ;;  %v96_v39 = vrot.slane %v4153_v18, 1  ;;  %v390_v41 = vld [vmem:[#allocation2 + $0xa8] sm:$0xff] }
  0x2c   :  { %3469 = vmatprep.subr.mxu1 %v180_v9  ;;  %3448 = vmatpush3.msra.mxu0 %v189_v8  ;;  %v164_v30 = vsel %vm4162_vm1, 0.0, %v93_v26  ;;  %v86_v32 = vsel %vm81_vm0, %v83_v28, %v85_v23  ;;  %vm4175_vm3 = vcmp.eq.s32.totalorder %v130_v24, 0  ;;  %v3027_v37 = vld [vmem:[%s4452_s3 + $0xf8] sm:$0xff]  ;;  %v389_v43 = vld [vmem:[#allocation2 + $0xa0] sm:$0xff]  ;;  %v3026_v46 = vld [vmem:[%s4452_s3 + $0xf0] sm:$0xff]  ;;  %v98_v50 = vrot.slane %v4158_v19, 1 }
  0x2d   :  { %3470 = vmatpush3.msra.mxu1 %v180_v9  ;;  %3449 = vmatprep.subr.mxu0 %v188_v11  ;;  %v166_v40 = vsel %vm4175_vm3, 0.0, %v86_v32  ;;  %v88_v42 = vsel %vm81_vm0, %v85_v23, %v87_v35  ;;  %v97_v44 = vsel %vm94_vm4, %v95_v38, %v96_v39  ;;  %v388_v47 = vld [vmem:[#allocation2 + $0x98] sm:$0xff]  ;;  %v3025_v48 = vld [vmem:[%s4452_s3 + $0xe8] sm:$0xff]  ;;  %v387_v49 = vld [vmem:[#allocation2 + $0x90] sm:$0xff]  ;;  %v123_v51 = vand.u32 15, %v109_v45 }
  0x2e   :  { %3471 = vmatprep.subr.mxu1 %v179_v12  ;;  %3450 = vmatpush3.msra.mxu0 %v188_v11  ;;  %v111_v52 = vadd.s32 24, %v4140_v7  ;;  %v3024_v53 = vld [vmem:[%s4452_s3 + $0xe0] sm:$0xff]  ;;  %v386_v54 = vld [vmem:[#allocation2 + $0x88] sm:$0xff]  ;;  %v100_v56 = vrot.slane %v4170_v29, 1  ;;  %v99_v57 = vsel %vm94_vm4, %v96_v39, %v98_v50  ;;  %v560_v60 = vld [vmem:[%s4452_s3 + $0x78] sm:$0xff] }
  0x2f   :  { %3472 = vmatpush3.msra.mxu1 %v179_v12  ;;  %3451 = vmatprep.subr.mxu0 %v187_v14  ;;  %v385_v55 = vld [vmem:[#allocation2 + $0x80] sm:$0xff]  ;;  %vm4217_vm5 = vcmp.eq.s32.totalorder %v123_v51, 15  ;;  %v559_v62 = vld [vmem:[%s4452_s3 + $0x70] sm:$0xff]  ;;  %v3023_v3 = vld [vmem:[%s4452_s3 + $0xd8] sm:$0xff] }
  0x30   :  { %3473 = vmatprep.subr.mxu1 %v178_v17  ;;  %3452 = vmatpush3.msra.mxu0 %v187_v14  ;;  %v137_v59 = vand.u32 15, %v111_v52  ;;  %v173_v61 = vsel %vm4217_vm5, 0.0, %v99_v57  ;;  %v101_v63 = vsel %vm94_vm4, %v98_v50, %v100_v56  ;;  %v106_v0 = vsel %vm94_vm4, %v100_v56, 0.0  ;;  %v558_v4 = vld [vmem:[%s4452_s3 + $0x68] sm:$0xff]  ;;  %v3022_v5 = vld [vmem:[%s4452_s3 + $0xd0] sm:$0xff]  ;;  %v557_v6 = vld [vmem:[%s4452_s3 + $0x60] sm:$0xff] }
  0x31   :  { %3474 = vmatpush3.msra.mxu1 %v178_v17  ;;  %3453 = vmatprep.subr.mxu0 %v186_v20  ;;  %v3021_v8 = vld [vmem:[%s4452_s3 + $0xc8] sm:$0xff]  ;;  %v556_v9 = vld [vmem:[%s4452_s3 + $0x58] sm:$0xff]  ;;  %v555_v11 = vld [vmem:[%s4452_s3 + $0x50] sm:$0xff] }
  0x32   :  { %3475 = vmatprep.subr.mxu1 %v177_v21  ;;  %3454 = vmatpush3.msra.mxu0 %v186_v20  ;;  %vm4231_vm6 = vcmp.eq.s32.totalorder %v137_v59, 15  ;;  %v3019_v12 = vld [vmem:[%s4452_s3 + $0xb8] sm:$0xff]  ;;  %v554_v13 = vld [vmem:[%s4452_s3 + $0x48] sm:$0xff]  ;;  %v3018_v14 = vld [vmem:[%s4452_s3 + $0xb0] sm:$0xff] }
  0x33   :  { %3476 = vmatpush3.msra.mxu1 %v177_v21  ;;  %3455 = vmatprep.subr.mxu0 %v185_v22  ;;  %v175_v2 = vsel %vm4231_vm6, 0.0, %v106_v0  ;;  %v553_v15 = vld [vmem:[%s4452_s3 + $0x40] sm:$0xff]  ;;  %v3017_v16 = vld [vmem:[%s4452_s3 + $0xa8] sm:$0xff]  ;;  %v552_v17 = vld [vmem:[%s4452_s3 + $0x38] sm:$0xff] }
  0x34   :  { %3477 = vmatprep.subr.mxu1 %v176_v25  ;;  %3456 = vmatpush3.msra.mxu0 %v185_v22  ;;  %v3015_v20 = vld [vmem:[%s4452_s3 + $0x98] sm:$0xff]  ;;  %v550_v21 = vld [vmem:[%s4452_s3 + $0x28] sm:$0xff]  ;;  %v3014_v22 = vld [vmem:[%s4452_s3 + $0x90] sm:$0xff] }
  0x35   :  { %3457 = vmatprep.mubr.msk.f32.mxu0 %vm193_vm2, %v4145_v10  ;;  %3478 = vmatpush3.msra.mxu1 %v176_v25  ;;  %v3020_v10 = vld [vmem:[%s4452_s3 + $0xc0] sm:$0xff]  ;;  %v3013_v24 = vld [vmem:[%s4452_s3 + $0x88] sm:$0xff]  ;;  %v548_v25 = vld [vmem:[%s4452_s3 + $0x18] sm:$0xff] }
  0x36   :  { %3479 = vmatprep.mubr.msk.f32.mxu1 %vm193_vm2, %v164_v30  ;;  %3458 = vmatmul.mubr.msk.f32.vlgmr.msra.gmra.mxu0 %vm193_vm2, %v4153_v18  ;;  %v3016_v18 = vld [vmem:[%s4452_s3 + $0xa0] sm:$0xff]  ;;  %v547_v28 = vld [vmem:[%s4452_s3 + $0x10] sm:$0xff]  ;;  %v3047_v30 = vld [vmem:[%s4452_s3 + $0x178] sm:$0xff] }
  0x37   :  { %3480 = vmatmul.mubr.msk.f32.vlgmr.msra.gmra.mxu1 %vm193_vm2, %v84_v34  ;;  %3485 = vmatprep.subr.mxu0 %v392_v31  ;;  %v549_v23 = vld [vmem:[%s4452_s3 + $0x20] sm:$0xff]  ;;  %v3629_v32 = vld [vmem:[#allocation4 + $0x74] ss:$8 sps:$4 sm:$0xff]   ;;  %vm3028_vm7 = vmneg %vm4162_vm1 }
  0x38   :  { %3460 = vmatprep.mubr.msk.f32.mxu0 %vm193_vm2, %v4158_v19  ;;  %3486 = vmatpush3.msra.mxu0 %v392_v31  ;;  %v551_v19 = vld [vmem:[%s4452_s3 + $0x30] sm:$0xff]  ;;  %v3012_v26 = vld [vmem:[%s4452_s3 + $0x80] sm:$0xff]  ;;  %vm3030_vm8 = vmneg %vm4175_vm3 }
  0x39   :  { %3482 = vmatprep.mubr.msk.f32.mxu1 %vm193_vm2, %v166_v40  ;;  %3487 = vmatprep.subr.mxu0 %v391_v36  ;;  %v545_v31 = vld [vmem:[%s4452_s3] sm:$0xff]  ;;  %v3046_v0 = vld [vmem:[%s4452_s3 + $0x170] sm:$0xff]  ;;  %vm3048_vm9 = vmneg %vm4217_vm5 }
  0x3a   :  { %3507 = vmatprep.subr.mxu1 %v3027_v37  ;;  %3488 = vmatpush3.msra.mxu0 %v391_v36  ;;  %v3042_v33 = vld [vmem:[%s4452_s3 + $0x150] sm:$0xff]  ;;  %vm3050_vm10 = vmneg %vm4231_vm6  ;;  %v3636_v58 = vld [vmem:[#allocation4 + $0x160] ss:$8 sps:$4 sm:$0xff]  }
  0x3b   :  { %3483 = vmatmul.mubr.msk.f32.gmra.mxu1 %vm193_vm2, %v88_v42  ;;  %3489 = vmatprep.subr.mxu0 %v390_v41  ;;  %v3653_v1 = vld [vmem:[#allocation4 + $0x34] ss:$8 sps:$4 sm:$0xff]  }
  0x3c   :  { %3461 = vmatmul.mubr.msk.f32.gmra.mxu0 %vm193_vm2, %v4170_v29  ;;  %3508 = vmatpush3.msra.mxu1 %v3027_v37  ;;  %v546_v29 = vld [vmem:[%s4452_s3 + $0x8] sm:$0xff] }
  0x3d   :  { %3490 = vmatpush3.msra.mxu0 %v390_v41  ;;  %3501 = vmatprep.mubr.msk.f32.mxu0 %vm193_vm2, %v97_v44 }
  0x3e   :  { %3491 = vmatprep.subr.mxu0 %v389_v43  ;;  %3509 = vmatprep.subr.mxu1 %v3026_v46 }
  0x3f   :  { %3492 = vmatpush3.msra.mxu0 %v389_v43  ;;  %3510 = vmatpush3.msra.mxu1 %v3026_v46  ;;  %v3011_v43 = vld [vmem:[%s4451_s2] ss:$0 sm:$0xff] }
  0x40   :  { %3493 = vmatprep.subr.mxu0 %v388_v47  ;;  %3511 = vmatprep.subr.mxu1 %v3025_v48 }
  0x41   :  { %3494 = vmatpush3.msra.mxu0 %v388_v47  ;;  %3512 = vmatpush3.msra.mxu1 %v3025_v48 }
  0x42   :  { %3495 = vmatprep.subr.mxu0 %v387_v49  ;;  %3513 = vmatprep.subr.mxu1 %v3024_v53 }
  0x43   :  { %3496 = vmatpush3.msra.mxu0 %v387_v49  ;;  %3514 = vmatpush3.msra.mxu1 %v3024_v53 }
  0x44   :  { %3497 = vmatprep.subr.mxu0 %v386_v54  ;;  %3515 = vmatprep.subr.mxu1 %v3023_v3 }
  0x45   :  { %3498 = vmatpush3.msra.mxu0 %v386_v54  ;;  %3516 = vmatpush3.msra.mxu1 %v3023_v3 }
  0x46   :  { %3499 = vmatprep.subr.mxu0 %v385_v55  ;;  %3517 = vmatprep.subr.mxu1 %v3022_v5 }
  0x47   :  { %3500 = vmatpush3.msra.mxu0 %v385_v55  ;;  %3518 = vmatpush3.msra.mxu1 %v3022_v5  ;;  %v3045_v5 = vld [vmem:[%s4452_s3 + $0x168] sm:$0xff] }
  0x48   :  { %3502 = vmatmul.mubr.msk.f32.vlgmr.msra.gmra.mxu0 %vm193_vm2, %v173_v61  ;;  %3545 = vmatprep.subr.mxu0 %v560_v60 }
  0x49   :  { %3504 = vmatprep.mubr.msk.f32.mxu0 %vm193_vm2, %v101_v63  ;;  %3546 = vmatpush3.msra.mxu0 %v560_v60 }
  0x4a   :  { %3547 = vmatprep.subr.mxu0 %v559_v62  ;;  %3519 = vmatprep.subr.mxu1 %v3021_v8 }
  0x4b   :  { %3548 = vmatpush3.msra.mxu0 %v559_v62  ;;  %3520 = vmatpush3.msra.mxu1 %v3021_v8 }
  0x4c   :  { %3505 = vmatmul.mubr.msk.f32.gmra.mxu0 %vm193_vm2, %v175_v2  ;;  %3549 = vmatprep.subr.mxu0 %v558_v4 }
  0x4d   :  { %3550 = vmatpush3.msra.mxu0 %v558_v4  ;;  %3521 = vmatprep.subr.mxu1 %v3020_v10 }
  0x4e   :  { %3551 = vmatprep.subr.mxu0 %v557_v6  ;;  %3522 = vmatpush3.msra.mxu1 %v3020_v10 }
  0x4f   :  { %3552 = vmatpush3.msra.mxu0 %v557_v6  ;;  %3523 = vmatprep.subr.mxu1 %v3019_v12 }
  0x50   :  { %3553 = vmatprep.subr.mxu0 %v556_v9  ;;  %3524 = vmatpush3.msra.mxu1 %v3019_v12 }
  0x51   :  { %3554 = vmatpush3.msra.mxu0 %v556_v9  ;;  %3525 = vmatprep.subr.mxu1 %v3018_v14 }
  0x52   :  { %3555 = vmatprep.subr.mxu0 %v555_v11  ;;  %3526 = vmatpush3.msra.mxu1 %v3018_v14 }
  0x53   :  { %3556 = vmatpush3.msra.mxu0 %v555_v11  ;;  %3527 = vmatprep.subr.mxu1 %v3017_v16  ;;  %v3044_v11 = vld [vmem:[%s4452_s3 + $0x160] sm:$0xff] }
  0x54   :  { %3557 = vmatprep.subr.mxu0 %v554_v13  ;;  %3528 = vmatpush3.msra.mxu1 %v3017_v16  ;;  %v3043_v16 = vld [vmem:[%s4452_s3 + $0x158] sm:$0xff] }
  0x55   :  { %3558 = vmatpush3.msra.mxu0 %v554_v13  ;;  %3529 = vmatprep.subr.mxu1 %v3016_v18 }
  0x56   :  { %3559 = vmatprep.subr.mxu0 %v553_v15  ;;  %3530 = vmatpush3.msra.mxu1 %v3016_v18  ;;  %v3633_v18 = vld [vmem:[#allocation4 + $0x60] ss:$8 sps:$4 sm:$0xff]  }
  0x57   :  { %3560 = vmatpush3.msra.mxu0 %v553_v15  ;;  %3531 = vmatprep.subr.mxu1 %v3015_v20  ;;  %v3627_v15 = vld [vmem:[#allocation4 + $0x70] ss:$8 sps:$4 sm:$0xff]  }
  0x58   :  { %3561 = vmatprep.subr.mxu0 %v552_v17  ;;  %3532 = vmatpush3.msra.mxu1 %v3015_v20  ;;  %v3641_v20 = vld [vmem:[#allocation4 + $0x54] ss:$8 sps:$4 sm:$0xff]  }
  0x59   :  { %3562 = vmatpush3.msra.mxu0 %v552_v17  ;;  %3533 = vmatprep.subr.mxu1 %v3014_v22  ;;  %v3635_v17 = vld [vmem:[#allocation4 + $0x64] ss:$8 sps:$4 sm:$0xff]  }
  0x5a   :  { %3563 = vmatprep.subr.mxu0 %v551_v19  ;;  %3534 = vmatpush3.msra.mxu1 %v3014_v22  ;;  %v3639_v22 = vld [vmem:[#allocation4 + $0x50] ss:$8 sps:$4 sm:$0xff]  }
  0x5b   :  { %3564 = vmatpush3.msra.mxu0 %v551_v19  ;;  %3535 = vmatprep.subr.mxu1 %v3013_v24  ;;  %v3041_v19 = vld [vmem:[%s4452_s3 + $0x148] sm:$0xff] }
  0x5c   :  { %3565 = vmatprep.subr.mxu0 %v550_v21  ;;  %3536 = vmatpush3.msra.mxu1 %v3013_v24  ;;  %v3038_v24 = vld [vmem:[%s4452_s3 + $0x130] sm:$0xff] }
  0x5d   :  { %3566 = vmatpush3.msra.mxu0 %v550_v21  ;;  %3537 = vmatprep.subr.mxu1 %v3012_v26  ;;  %v3040_v21 = vld [vmem:[%s4452_s3 + $0x140] sm:$0xff] }
  0x5e   :  { %3567 = vmatprep.subr.mxu0 %v549_v23  ;;  %3538 = vmatpush3.msra.mxu1 %v3012_v26  ;;  %v3036_v26 = vld [vmem:[%s4452_s3 + $0x120] sm:$0xff] }
  0x5f   :  { %3568 = vmatpush3.msra.mxu0 %v549_v23  ;;  %3583 = vmatprep.subr.mxu1 %v3047_v30  ;;  %v3039_v23 = vld [vmem:[%s4452_s3 + $0x138] sm:$0xff] }
  0x60   :  { %3569 = vmatprep.subr.mxu0 %v548_v25 }
  0x61   :  { %3570 = vmatpush3.msra.mxu0 %v548_v25  ;;  %v3037_v25 = vld [vmem:[%s4452_s3 + $0x128] sm:$0xff] }
  0x62   :  { %3571 = vmatprep.subr.mxu0 %v547_v28 }
  0x63   :  { %3572 = vmatpush3.msra.mxu0 %v547_v28  ;;  %v3035_v28 = vld [vmem:[%s4452_s3 + $0x118] sm:$0xff] }
  0x64   :  { %3573 = vmatprep.subr.mxu0 %v546_v29 }
  0x65   :  { %3574 = vmatpush3.msra.mxu0 %v546_v29  ;;  %v3034_v29 = vld [vmem:[%s4452_s3 + $0x110] sm:$0xff] }
  0x66   :  { %3575 = vmatprep.subr.mxu0 %v545_v31 }
  0x67   :  { %3576 = vmatpush3.msra.mxu0 %v545_v31 }
  0x68   :  { %2553 = vmatprep.subr.bf16.mxu0 %v3629_v32  ;;  %v3032_v32 = vld [vmem:[%s4452_s3 + $0x100] sm:$0xff] }
  0xf6   :  { %v3459_v34 = vpop.f32.mrf.mxu0 }
  0xf7   :  { %v3481_v35 = vpop.f32.mrf.mxu1 }
  0xf8   :  { %v268_v36 = vpop.f32.mrf.mxu0  ;;  %v371_v41 = vadd.f32 %v3481_v35, %v3459_v34  ;;  %v3632_v34 = vld [vmem:[#allocation4 + $0x174] ss:$8 sps:$4 sm:$0xff]   ;;  %v3630_v35 = vld [vmem:[#allocation4 + $0x170] ss:$8 sps:$4 sm:$0xff]  }
  0xf9   :  { %v365_v38 = vpop.f32.mrf.mxu1 }
  0xfa   :  { %v366_v44 = vadd.f32 %v365_v38, %v268_v36 }
  0xfb   :  { %v3484_v39 = vpop.f32.mrf.mxu1 }
  0xfc   :  { %v3462_v37 = vpop.f32.mrf.mxu0 }
  0xfd   :  { %v375_v46 = vpop.f32.mrf.mxu1  ;;  %v381_v48 = vadd.f32 %v3484_v39, %v3462_v37  ;;  %v3638_v37 = vld [vmem:[#allocation4 + $0x164] ss:$8 sps:$4 sm:$0xff]  }
  0xfe   :  { %v278_v40 = vpop.f32.mrf.mxu0 }
  0xff   :  { %v376_v52 = vadd.f32 %v375_v46, %v278_v40  ;;  %v3648_v46 = vld [vmem:[#allocation4 + $0x140] ss:$8 sps:$4 sm:$0xff]  }
 0x108   :  { %v3503_v42 = vpop.f32.mrf.mxu0 }
 0x109   :  { %v491_v45 = vadd.f32 %v3503_v42, %v371_v41  ;;  %v3642_v41 = vld [vmem:[#allocation4 + $0x150] ss:$8 sps:$4 sm:$0xff]   ;;  %v3644_v42 = vld [vmem:[#allocation4 + $0x154] ss:$8 sps:$4 sm:$0xff]  }
 0x10a   :  { %v471_v47 = vpop.f32.mrf.mxu0 }
 0x10b   :  { %v502_v49 = vadd.f32 %v3011_v43, %v491_v45  ;;  %v490_v50 = vadd.f32 %v471_v47, %v366_v44  ;;  %v3647_v44 = vld [vmem:[#allocation4 + $0x44] ss:$8 sps:$4 sm:$0xff]   ;;  %v3651_v47 = vld [vmem:[#allocation4 + $0x30] ss:$8 sps:$4 sm:$0xff]  }
 0x10c   :  { %v3506_v51 = vpop.f32.mrf.mxu0  ;;  %v3650_v45 = vld [vmem:[#allocation4 + $0x144] ss:$8 sps:$4 sm:$0xff]  }
 0x10d   :  { %v4324_v53 = vmax.f32 %v502_v49, 0.0  ;;  %v501_v54 = vadd.f32 %v3011_v43, %v490_v50  ;;  %v493_v55 = vadd.f32 %v3506_v51, %v381_v48  ;;  %v3656_v48 = vld [vmem:[#allocation4 + $0x134] ss:$8 sps:$4 sm:$0xff]   ;;  %v3654_v49 = vld [vmem:[#allocation4 + $0x130] ss:$8 sps:$4 sm:$0xff]  }
 0x10e   :  { %v481_v56 = vpop.f32.mrf.mxu0  ;;  %v3659_v50 = vld [vmem:[#allocation4 + $0x24] ss:$8 sps:$4 sm:$0xff]   ;;  %v3657_v51 = vld [vmem:[#allocation4 + $0x20] ss:$8 sps:$4 sm:$0xff]  }
 0x10f   :  { %v505_v57 = vmax.f32 %v501_v54, 0.0  ;;  %v504_v59 = vadd.f32 %v3011_v43, %v493_v55  ;;  %v492_v60 = vadd.f32 %v481_v56, %v376_v52  ;;  %v514_v61 = vrot.slane %v4324_v53, 7  ;;  %v3660_v52 = vld [vmem:[#allocation4 + $0x120] ss:$8 sps:$4 sm:$0xff]   ;;  %v3665_v54 = vld [vmem:[#allocation4 + $0x14] ss:$8 sps:$4 sm:$0xff]  }
 0x110   :  { %v526_v9 = vrot.slane %v4324_v53, 1  ;;  %v3663_v55 = vld [vmem:[#allocation4 + $0x10] ss:$8 sps:$4 sm:$0xff]   ;;  %v3668_v56 = vld [vmem:[#allocation4 + $0x114] ss:$8 sps:$4 sm:$0xff]  }
 0x111   :  { %v4329_v62 = vmax.f32 %v504_v59, 0.0  ;;  %v503_v63 = vadd.f32 %v3011_v43, %v492_v60  ;;  %3539 = vmatprep.mubr.f32.mxu1 %v505_v57  ;;  %v513_v2 = vrot.slane %v505_v57, 7  ;;  %v525_v6 = vrot.slane %v505_v57, 1  ;;  %v3645_v43 = vld [vmem:[#allocation4 + $0x40] ss:$8 sps:$4 sm:$0xff]  }
 0x112   :  { %3540 = vmatmul.mubr.f32.vlgmr.msra.gmra.mxu1 %v4324_v53  ;;  %v3662_v53 = vld [vmem:[#allocation4 + $0x124] ss:$8 sps:$4 sm:$0xff]   ;;  %v3666_v59 = vld [vmem:[#allocation4 + $0x110] ss:$8 sps:$4 sm:$0xff]  }
 0x113   :  { %v4335_v3 = vmax.f32 %v503_v63, 0.0  ;;  %3584 = vmatpush3.msra.mxu1 %v3047_v30  ;;  %v524_v4 = vsel %vm81_vm0, 0.0, %v513_v2  ;;  %v515_v27 = vsel %vm81_vm0, %v513_v2, %v514_v61  ;;  %v518_v10 = vrot.slane %v4329_v62, 7  ;;  %v3033_v30 = vld [vmem:[%s4452_s3 + $0x108] sm:$0xff]  ;;  %v3675_v2 = vld [vmem:[#allocation4 + $0xf0] ss:$8 sps:$4 sm:$0xff]  }
 0x114   :  { %3585 = vmatprep.subr.mxu1 %v3046_v0  ;;  %3577 = vmatprep.mubr.msk.f32.mxu0 %vm3028_vm7, %v524_v4  ;;  %v527_v12 = vsel %vm94_vm4, %v525_v6, %v526_v9  ;;  %v530_v36 = vrot.slane %v4329_v62, 1  ;;  %v3671_v57 = vld [vmem:[#allocation4 + $0x4] ss:$8 sps:$4 sm:$0xff]   ;;  %v3672_v63 = vld [vmem:[#allocation4 + $0x100] ss:$8 sps:$4 sm:$0xff]  }
 0x115   :  { %v516_v8 = vrot.slane %v4335_v3, 7  ;;  %3586 = vmatpush3.msra.mxu1 %v3046_v0  ;;  %3542 = vmatprep.mubr.f32.mxu1 %v4335_v3  ;;  %v528_v31 = vrot.slane %v4335_v3, 1  ;;  %v3674_v60 = vld [vmem:[#allocation4 + $0x104] ss:$8 sps:$4 sm:$0xff]   ;;  %v3680_v0 = vld [vmem:[#allocation4 + $0x1f4] ss:$8 sps:$4 sm:$0xff]  }
 0x116   :  { %3578 = vmatmul.mubr.f32.vlgmr.msra.gmra.mxu0 %v515_v27  ;;  %3587 = vmatprep.subr.mxu1 %v3045_v5  ;;  %v536_v40 = vsel %vm94_vm4, %v530_v36, 0.0  ;;  %v3683_v3 = vld [vmem:[#allocation4 + $0xe4] ss:$8 sps:$4 sm:$0xff]   ;;  %v3678_v4 = vld [vmem:[#allocation4 + $0x1f0] ss:$8 sps:$4 sm:$0xff]  }
 0x117   :  { %3543 = vmatmul.mubr.f32.gmra.mxu1 %v4329_v62  ;;  %v517_v13 = vsel %vm81_vm0, %v514_v61, %v516_v8  ;;  %v519_v14 = vsel %vm81_vm0, %v516_v8, %v518_v10  ;;  %2554 = vmatpush1.bf16.msra.mxu0 %v3627_v15  ;;  %v529_v38 = vsel %vm94_vm4, %v526_v9, %v528_v31  ;;  %v3669_v61 = vld [vmem:[#allocation4] ss:$8 sps:$4 sm:$0xff]   ;;  %v3677_v62 = vld [vmem:[#allocation4 + $0xf4] ss:$8 sps:$4 sm:$0xff]   ;;  %v3686_v27 = vld [vmem:[#allocation4 + $0x1e4] ss:$8 sps:$4 sm:$0xff]  }
 0x118   :  { %3588 = vmatpush3.msra.mxu1 %v3045_v5  ;;  %3615 = vmatprep.mubr.f32.mxu1 %v527_v12  ;;  %v531_v39 = vsel %vm94_vm4, %v528_v31, %v530_v36  ;;  %v3681_v5 = vld [vmem:[#allocation4 + $0xe0] ss:$8 sps:$4 sm:$0xff]   ;;  %v3689_v6 = vld [vmem:[#allocation4 + $0xd4] ss:$8 sps:$4 sm:$0xff]   ;;  %v3687_v9 = vld [vmem:[#allocation4 + $0xd0] ss:$8 sps:$4 sm:$0xff]  }
 0x119   :  { %3589 = vmatprep.subr.mxu1 %v3044_v11  ;;  %3580 = vmatprep.mubr.msk.f32.mxu0 %vm3030_vm8, %v517_v13  ;;  %v3684_v8 = vld [vmem:[#allocation4 + $0x1e0] ss:$8 sps:$4 sm:$0xff]   ;;  %v3692_v10 = vld [vmem:[#allocation4 + $0x1d4] ss:$8 sps:$4 sm:$0xff]   ;;  %v3695_v12 = vld [vmem:[#allocation4 + $0xc4] ss:$8 sps:$4 sm:$0xff]  }
 0x11a   :  { %3590 = vmatpush3.msra.mxu1 %v3044_v11  ;;  %3581 = vmatmul.mubr.f32.gmra.mxu0 %v519_v14  ;;  %v3690_v11 = vld [vmem:[#allocation4 + $0x1d0] ss:$8 sps:$4 sm:$0xff]   ;;  %v3693_v13 = vld [vmem:[#allocation4 + $0xc0] ss:$8 sps:$4 sm:$0xff]   ;;  %v3698_v14 = vld [vmem:[#allocation4 + $0x1c4] ss:$8 sps:$4 sm:$0xff]  }
 0x11b   :  { %3591 = vmatprep.subr.mxu1 %v3043_v16  ;;  %2555 = vmatprep.subr.bf16.mxu0 %v3635_v17  ;;  %v3696_v15 = vld [vmem:[#allocation4 + $0x1c0] ss:$8 sps:$4 sm:$0xff]   ;;  %v3699_v17 = vld [vmem:[#allocation4 + $0xb0] ss:$8 sps:$4 sm:$0xff]  }
 0x11c   :  { %3592 = vmatpush3.msra.mxu1 %v3043_v16  ;;  %2556 = vmatpush1.bf16.msra.mxu0 %v3633_v18  ;;  %v3701_v16 = vld [vmem:[#allocation4 + $0xb4] ss:$8 sps:$4 sm:$0xff]   ;;  %v3702_v18 = vld [vmem:[#allocation4 + $0x1b0] ss:$8 sps:$4 sm:$0xff]   ;;  %v3720_v31 = vld [vmem:[#allocation4 + $0x180] ss:$8 sps:$4 sm:$0xff]  }
 0x11d   :  { %3593 = vmatprep.subr.mxu1 %v3042_v33  ;;  %2557 = vmatprep.subr.bf16.mxu0 %v3641_v20  ;;  %v3705_v20 = vld [vmem:[#allocation4 + $0xa0] ss:$8 sps:$4 sm:$0xff]  }
 0x11e   :  { %3594 = vmatpush3.msra.mxu1 %v3042_v33  ;;  %v3704_v33 = vld [vmem:[#allocation4 + $0x1b4] ss:$8 sps:$4 sm:$0xff]  }
 0x11f   :  { %3595 = vmatprep.subr.mxu1 %v3041_v19 }
 0x120   :  { %3596 = vmatpush3.msra.mxu1 %v3041_v19  ;;  %2558 = vmatpush1.bf16.msra.mxu0 %v3639_v22  ;;  %v3707_v19 = vld [vmem:[#allocation4 + $0xa4] ss:$8 sps:$4 sm:$0xff]   ;;  %v3708_v22 = vld [vmem:[#allocation4 + $0x1a0] ss:$8 sps:$4 sm:$0xff]  }
 0x121   :  { %3597 = vmatprep.subr.mxu1 %v3040_v21  ;;  %2559 = vmatprep.subr.bf16.mxu0 %v3647_v44  ;;  %v3052_v44 = vld [vmem:[%s4453_s4] ss:$0 sm:$0xff] }
 0x122   :  { %3598 = vmatpush3.msra.mxu1 %v3040_v21  ;;  %v3710_v21 = vld [vmem:[#allocation4 + $0x1a4] ss:$8 sps:$4 sm:$0xff]  }
 0x123   :  { %3599 = vmatprep.subr.mxu1 %v3039_v23 }
 0x124   :  { %3600 = vmatpush3.msra.mxu1 %v3039_v23  ;;  %2560 = vmatpush1.bf16.msra.mxu0 %v3645_v43  ;;  %v3713_v23 = vld [vmem:[#allocation4 + $0x94] ss:$8 sps:$4 sm:$0xff]  }
 0x125   :  { %3601 = vmatprep.subr.mxu1 %v3038_v24  ;;  %2561 = vmatprep.subr.bf16.mxu0 %v3653_v1 }
 0x126   :  { %3602 = vmatpush3.msra.mxu1 %v3038_v24  ;;  %v3711_v24 = vld [vmem:[#allocation4 + $0x90] ss:$8 sps:$4 sm:$0xff]  }
 0x127   :  { %3603 = vmatprep.subr.mxu1 %v3037_v25 }
 0x128   :  { %3604 = vmatpush3.msra.mxu1 %v3037_v25  ;;  %2562 = vmatpush1.bf16.msra.mxu0 %v3651_v47  ;;  %v3716_v25 = vld [vmem:[#allocation4 + $0x194] ss:$8 sps:$4 sm:$0xff]  }
 0x129   :  { %3605 = vmatprep.subr.mxu1 %v3036_v26  ;;  %2563 = vmatprep.subr.bf16.mxu0 %v3659_v50 }
 0x12a   :  { %3606 = vmatpush3.msra.mxu1 %v3036_v26  ;;  %v3714_v26 = vld [vmem:[#allocation4 + $0x190] ss:$8 sps:$4 sm:$0xff]  }
 0x12b   :  { %3607 = vmatprep.subr.mxu1 %v3035_v28 }
 0x12c   :  { %3608 = vmatpush3.msra.mxu1 %v3035_v28  ;;  %2564 = vmatpush1.bf16.msra.mxu0 %v3657_v51  ;;  %v3719_v28 = vld [vmem:[#allocation4 + $0x84] ss:$8 sps:$4 sm:$0xff]  }
 0x12d   :  { %3609 = vmatprep.subr.mxu1 %v3034_v29  ;;  %2565 = vmatprep.subr.bf16.mxu0 %v3665_v54 }
 0x12e   :  { %3610 = vmatpush3.msra.mxu1 %v3034_v29  ;;  %v3717_v29 = vld [vmem:[#allocation4 + $0x80] ss:$8 sps:$4 sm:$0xff]  }
 0x12f   :  { %3611 = vmatprep.subr.mxu1 %v3033_v30 }
 0x130   :  { %3612 = vmatpush3.msra.mxu1 %v3033_v30  ;;  %2566 = vmatpush1.bf16.msra.mxu0 %v3663_v55  ;;  %v3722_v30 = vld [vmem:[#allocation4 + $0x184] ss:$8 sps:$4 sm:$0xff]  }
 0x131   :  { %3613 = vmatprep.subr.mxu1 %v3032_v32  ;;  %2567 = vmatprep.subr.bf16.mxu0 %v3671_v57 }
 0x132   :  { %3614 = vmatpush3.msra.mxu1 %v3032_v32  ;;  %v3725_v32 = vld [vmem:[#allocation4 + $0x274] ss:$8 sps:$4 sm:$0xff]  }
 0x133   :  { %3616 = vmatmul.mubr.msk.f32.vlgmr.msra.gmra.mxu1 %vm3048_vm9, %v529_v38  ;;  %2594 = vmatprep.subr.bf16.mxu1 %v3632_v34  ;;  %v3728_v34 = vld [vmem:[#allocation4 + $0x374] ss:$8 sps:$4 sm:$0xff]  }
 0x134   :  { %3618 = vmatprep.mubr.f32.mxu1 %v531_v39  ;;  %2595 = vmatpush1.bf16.msra.mxu1 %v3630_v35 }
 0x135   :  { %2596 = vmatprep.subr.bf16.mxu1 %v3638_v37  ;;  %2568 = vmatpush1.bf16.msra.mxu0 %v3669_v61 }
 0x136   :  { %2569 = vmatprep.subr.bf16.mxu0 %v3677_v62 }
 0x137   :  { %3619 = vmatmul.mubr.msk.f32.gmra.mxu1 %vm3050_vm10, %v536_v40 }
 0x138   :  { %2597 = vmatpush1.bf16.msra.mxu1 %v3636_v58 }
 0x139   :  { %2598 = vmatprep.subr.bf16.mxu1 %v3644_v42  ;;  %2570 = vmatpush2.bf16.msra.mxu0 %v3675_v2 }
 0x13a   :  { %2571 = vmatprep.subr.bf16.mxu0 %v3683_v3 }
 0x13c   :  { %2599 = vmatpush1.bf16.msra.mxu1 %v3642_v41 }
 0x13d   :  { %2600 = vmatprep.subr.bf16.mxu1 %v3650_v45  ;;  %2572 = vmatpush2.bf16.msra.mxu0 %v3681_v5  ;;  %v4080_v45 = vmov 1966171168  }
 0x13e   :  { %2573 = vmatprep.subr.bf16.mxu0 %v3689_v6 }
 0x140   :  { %2601 = vmatpush1.bf16.msra.mxu1 %v3648_v46  ;;  %v876_v46 = vunpack.c.l.s4 %v4080_v45  ;;  %v3741_v45 = vld [vmem:[#allocation4 + $0x240] ss:$8 sps:$4 sm:$0xff]  }
 0x141   :  { %2602 = vmatprep.subr.bf16.mxu1 %v3656_v48  ;;  %2574 = vmatpush2.bf16.msra.mxu0 %v3687_v9 }
 0x142   :  { %2575 = vmatprep.subr.bf16.mxu0 %v3695_v12 }
 0x144   :  { %2603 = vmatpush1.bf16.msra.mxu1 %v3654_v49 }
 0x145   :  { %2604 = vmatprep.subr.bf16.mxu1 %v3662_v53  ;;  %2576 = vmatpush2.bf16.msra.mxu0 %v3693_v13  ;;  %v877_v53 = vunpack.c.0.s8 %v876_v46  ;;  %v3749_v46 = vld [vmem:[#allocation4 + $0x234] ss:$8 sps:$4 sm:$0xff]  }
 0x146   :  { %2577 = vmatprep.subr.bf16.mxu0 %v3701_v16 }
 0x147   :  { %v880_v61 = vsub.s32 %v877_v53, %v4140_v7  ;;  %v3761_v53 = vld [vmem:[#allocation4 + $0x214] ss:$8 sps:$4 sm:$0xff]  }
 0x148   :  { %2605 = vmatpush1.bf16.msra.mxu1 %v3660_v52 }
 0x149   :  { %2606 = vmatprep.subr.bf16.mxu1 %v3668_v56  ;;  %2578 = vmatpush2.bf16.msra.mxu0 %v3699_v17 }
 0x14a   :  { %2579 = vmatprep.subr.bf16.mxu0 %v3707_v19 }
 0x14c   :  { %2607 = vmatpush1.bf16.msra.mxu1 %v3666_v59 }
 0x14d   :  { %2608 = vmatprep.subr.bf16.mxu1 %v3674_v60  ;;  %2580 = vmatpush2.bf16.msra.mxu0 %v3705_v20 }
 0x14e   :  { %2581 = vmatprep.subr.bf16.mxu0 %v3713_v23 }
 0x150   :  { %2609 = vmatpush1.bf16.msra.mxu1 %v3672_v63 }
 0x151   :  { %2610 = vmatprep.subr.bf16.mxu1 %v3680_v0  ;;  %2582 = vmatpush2.bf16.msra.mxu0 %v3711_v24 }
 0x152   :  { %2583 = vmatprep.subr.bf16.mxu0 %v3719_v28 }
 0x154   :  { %2611 = vmatpush2.bf16.msra.mxu1 %v3678_v4 }
 0x155   :  { %2612 = vmatprep.subr.bf16.mxu1 %v3686_v27  ;;  %2584 = vmatpush2.bf16.msra.mxu0 %v3717_v29 }
 0x156   :  { %2635 = vmatprep.subr.bf16.mxu0 %v3725_v32  ;;  %v3731_v32 = vld [vmem:[#allocation4 + $0x264] ss:$8 sps:$4 sm:$0xff]  }
 0x158   :  { %2613 = vmatpush2.bf16.msra.mxu1 %v3684_v8 }
 0x159   :  { %2614 = vmatprep.subr.bf16.mxu1 %v3692_v10 }
 0x15c   :  { %2615 = vmatpush2.bf16.msra.mxu1 %v3690_v11 }
 0x15d   :  { %2616 = vmatprep.subr.bf16.mxu1 %v3698_v14 }
 0x160   :  { %2617 = vmatpush2.bf16.msra.mxu1 %v3696_v15 }
 0x161   :  { %2618 = vmatprep.subr.bf16.mxu1 %v3704_v33 }
 0x164   :  { %2619 = vmatpush2.bf16.msra.mxu1 %v3702_v18 }
 0x165   :  { %2620 = vmatprep.subr.bf16.mxu1 %v3710_v21 }
 0x168   :  { %2621 = vmatpush2.bf16.msra.mxu1 %v3708_v22 }
 0x169   :  { %2622 = vmatprep.subr.bf16.mxu1 %v3716_v25  ;;  %v3723_v25 = vld [vmem:[#allocation4 + $0x270] ss:$8 sps:$4 sm:$0xff]  }
 0x16c   :  { %2623 = vmatpush2.bf16.msra.mxu1 %v3714_v26 }
 0x16d   :  { %2624 = vmatprep.subr.bf16.mxu1 %v3722_v30 }
 0x170   :  { %2625 = vmatpush2.bf16.msra.mxu1 %v3720_v31  ;;  %v3726_v31 = vld [vmem:[#allocation4 + $0x370] ss:$8 sps:$4 sm:$0xff]  }
 0x171   :  { %2676 = vmatprep.subr.bf16.mxu1 %v3728_v34 }
 0x1d2   :  { %v3541_v35 = vpop.f32.mrf.mxu1 }
 0x1d4   :  { %v644_v36 = vpop.f32.mrf.mxu1 }
 0x1d6   :  { %v3579_v37 = vpop.f32.mrf.mxu0 }
 0x1d7   :  { %v735_v38 = vadd.f32 %v3579_v37, %v3541_v35  ;;  %v3544_v58 = vpop.f32.mrf.mxu1  ;;  %v3729_v37 = vld [vmem:[#allocation4 + $0x260] ss:$8 sps:$4 sm:$0xff]  }
 0x1d8   :  { %v729_v39 = vpop.f32.mrf.mxu0 }
 0x1d9   :  { %v654_v42 = vpop.f32.mrf.mxu1  ;;  %v730_v1 = vadd.f32 %v729_v39, %v644_v36  ;;  %v3734_v36 = vld [vmem:[#allocation4 + $0x364] ss:$8 sps:$4 sm:$0xff]   ;;  %v3737_v39 = vld [vmem:[#allocation4 + $0x254] ss:$8 sps:$4 sm:$0xff]  }
 0x1da   :  { %v3582_v40 = vpop.f32.mrf.mxu0 }
 0x1db   :  { %v745_v41 = vadd.f32 %v3582_v40, %v3544_v58  ;;  %v3732_v58 = vld [vmem:[#allocation4 + $0x360] ss:$8 sps:$4 sm:$0xff]   ;;  %v3740_v40 = vld [vmem:[#allocation4 + $0x354] ss:$8 sps:$4 sm:$0xff]  }
 0x1dc   :  { %v739_v48 = vpop.f32.mrf.mxu0 }
 0x1dd   :  { %v740_v54 = vadd.f32 %v739_v48, %v654_v42  ;;  %v3743_v42 = vld [vmem:[#allocation4 + $0x244] ss:$8 sps:$4 sm:$0xff]   ;;  %v3747_v48 = vld [vmem:[#allocation4 + $0x230] ss:$8 sps:$4 sm:$0xff]  }
 0x1f3   :  { %v3617_v43 = vpop.f32.mrf.mxu1 }
 0x1f4   :  { %v851_v47 = vadd.f32 %v3617_v43, %v735_v38  ;;  %v3738_v43 = vld [vmem:[#allocation4 + $0x350] ss:$8 sps:$4 sm:$0xff]  }
 0x1f5   :  { %v831_v49 = vpop.f32.mrf.mxu1 }
 0x1f6   :  { %v862_v50 = vadd.f32 %v3052_v44, %v851_v47  ;;  %v850_v51 = vadd.f32 %v831_v49, %v730_v1  ;;  %v3744_v1 = vld [vmem:[#allocation4 + $0x340] ss:$8 sps:$4 sm:$0xff]   ;;  %v3752_v47 = vld [vmem:[#allocation4 + $0x334] ss:$8 sps:$4 sm:$0xff]   ;;  %v3755_v49 = vld [vmem:[#allocation4 + $0x224] ss:$8 sps:$4 sm:$0xff]  }
 0x1f7   :  { %v3620_v52 = vpop.f32.mrf.mxu1 }
 0x1f8   :  { %v853_v55 = vadd.f32 %v3620_v52, %v745_v41  ;;  %v861_v57 = vadd.f32 %v3052_v44, %v850_v51  ;;  %v866_v62 = vmax.f32 %v862_v50, 0.0  ;;  %v3735_v41 = vld [vmem:[#allocation4 + $0x250] ss:$8 sps:$4 sm:$0xff]   ;;  %v3758_v51 = vld [vmem:[#allocation4 + $0x324] ss:$8 sps:$4 sm:$0xff]  }
 0x1f9   :  { %v841_v56 = vpop.f32.mrf.mxu1  ;;  %v3750_v50 = vld [vmem:[#allocation4 + $0x330] ss:$8 sps:$4 sm:$0xff]   ;;  %v3753_v52 = vld [vmem:[#allocation4 + $0x220] ss:$8 sps:$4 sm:$0xff]  }
 0x1fa   :  { %v864_v59 = vadd.f32 %v3052_v44, %v853_v55  ;;  %v852_v60 = vadd.f32 %v841_v56, %v740_v54  ;;  %v865_v2 = vmax.f32 %v861_v57, 0.0  ;;  %v3756_v54 = vld [vmem:[#allocation4 + $0x320] ss:$8 sps:$4 sm:$0xff]   ;;  %v3764_v55 = vld [vmem:[#allocation4 + $0x314] ss:$8 sps:$4 sm:$0xff]  }
 0x1fb   :  { %v3759_v56 = vld [vmem:[#allocation4 + $0x210] ss:$8 sps:$4 sm:$0xff]   ;;  %v3767_v57 = vld [vmem:[#allocation4 + $0x204] ss:$8 sps:$4 sm:$0xff]  }
 0x1fc   :  { %v868_v63 = vmax.f32 %v864_v59, 0.0  ;;  %v863_v0 = vadd.f32 %v3052_v44, %v852_v60  ;;  %v3746_v44 = vld [vmem:[#allocation4 + $0x344] ss:$8 sps:$4 sm:$0xff]   ;;  %v3762_v59 = vld [vmem:[#allocation4 + $0x310] ss:$8 sps:$4 sm:$0xff]  }
 0x1fd   :  { %v3770_v60 = vld [vmem:[#allocation4 + $0x304] ss:$8 sps:$4 sm:$0xff]  }
 0x1fe   :  { %v923_v3 = vcombine.low %v866_v62, %v868_v63  ;;  %v924_v4 = vcombine.high %v866_v62, %v868_v63  ;;  %v867_v27 = vmax.f32 %v863_v0, 0.0  ;;  %v3773_v62 = vld [vmem:[#allocation4 + $0x2f4] ss:$8 sps:$4 sm:$0xff]   ;;  %v3768_v63 = vld [vmem:[#allocation4 + $0x300] ss:$8 sps:$4 sm:$0xff]  }
 0x1ff   :  { %v3776_v0 = vld [vmem:[#allocation4 + $0x3f4] ss:$8 sps:$4 sm:$0xff]  }
 0x200   :  { %v931_v5 = vrot.slane %v923_v3, %v880_v61  ;;  %v938_v6 = vrot.slane %v924_v4, %v880_v61  ;;  %v873_v8 = vcombine.low %v865_v2, %v867_v27  ;;  %v874_v9 = vcombine.high %v865_v2, %v867_v27  ;;  %v3771_v2 = vld [vmem:[#allocation4 + $0x2f0] ss:$8 sps:$4 sm:$0xff]   ;;  %v3779_v3 = vld [vmem:[#allocation4 + $0x2e4] ss:$8 sps:$4 sm:$0xff]  }
 0x201   :  { %v3774_v4 = vld [vmem:[#allocation4 + $0x3f0] ss:$8 sps:$4 sm:$0xff]   ;;  %v3782_v27 = vld [vmem:[#allocation4 + $0x3e4] ss:$8 sps:$4 sm:$0xff]  }
 0x202   :  { %v4408_v10 = vrot.slane %v931_v5, %v880_v61  ;;  %v4410_v11 = vrot.slane %v938_v6, %v880_v61  ;;  %v881_v12 = vrot.slane %v873_v8, %v880_v61  ;;  %v888_v13 = vrot.slane %v874_v9, %v880_v61  ;;  %v3780_v8 = vld [vmem:[#allocation4 + $0x3e0] ss:$8 sps:$4 sm:$0xff]   ;;  %v3788_v9 = vld [vmem:[#allocation4 + $0x3d4] ss:$8 sps:$4 sm:$0xff]  }
 0x203   :  { %v939_v14 = vcombine.high %v931_v5, %v931_v5  ;;  %v940_v15 = vcombine.high %v938_v6, %v938_v6  ;;  %v3777_v5 = vld [vmem:[#allocation4 + $0x2e0] ss:$8 sps:$4 sm:$0xff]   ;;  %v3785_v6 = vld [vmem:[#allocation4 + $0x2d4] ss:$8 sps:$4 sm:$0xff]  }
 0x204   :  { %v897_v16 = vrot.slane %v881_v12, %v880_v61  ;;  %v4412_v17 = vrot.slane %v888_v13, %v880_v61  ;;  %v889_v33 = vcombine.high %v881_v12, %v881_v12  ;;  %v890_v18 = vcombine.high %v888_v13, %v888_v13  ;;  %v3783_v12 = vld [vmem:[#allocation4 + $0x2d0] ss:$8 sps:$4 sm:$0xff]   ;;  %v3791_v13 = vld [vmem:[#allocation4 + $0x2c4] ss:$8 sps:$4 sm:$0xff]  }
 0x205   :  { %v4414_v19 = vrot.slane %v939_v14, %v880_v61  ;;  %v4416_v20 = vrot.slane %v940_v15, %v880_v61  ;;  %v3786_v14 = vld [vmem:[#allocation4 + $0x3d0] ss:$8 sps:$4 sm:$0xff]   ;;  %v3794_v15 = vld [vmem:[#allocation4 + $0x3c4] ss:$8 sps:$4 sm:$0xff]  }
 0x206   :  { %v911_v21 = vrot.slane %v889_v33, %v880_v61  ;;  %v918_v22 = vrot.slane %v890_v18, %v880_v61  ;;  %v919_v23 = vcombine.high %v897_v16, %v897_v16  ;;  %v989_v28 = vpack.c.bf16 %v897_v16, %v897_v16  ;;  %v3765_v61 = vld [vmem:[#allocation4 + $0x200] ss:$8 sps:$4 sm:$0xff]   ;;  %v3797_v33 = vld [vmem:[#allocation4 + $0x2b4] ss:$8 sps:$4 sm:$0xff]  }
 0x207   :  { %v3789_v16 = vld [vmem:[#allocation4 + $0x2c0] ss:$8 sps:$4 sm:$0xff]  }
 0x208   :  { %v990_v24 = vpack.c.bf16 %v911_v21, %v911_v21  ;;  %v921_v26 = vcombine.high %v911_v21, %v911_v21  ;;  %v922_v29 = vcombine.high %v918_v22, %v918_v22  ;;  %v991_v34 = vpack.c.bf16 %v919_v23, %v919_v23  ;;  %v3792_v18 = vld [vmem:[#allocation4 + $0x3c0] ss:$8 sps:$4 sm:$0xff]   ;;  %v3800_v21 = vld [vmem:[#allocation4 + $0x3b4] ss:$8 sps:$4 sm:$0xff]   ;;  %v3803_v23 = vld [vmem:[#allocation4 + $0x2a4] ss:$8 sps:$4 sm:$0xff]  }
 0x209   :  { %v994_v35 = vpack.c.bf16 %v918_v22, %v918_v22  ;;  %v3795_v22 = vld [vmem:[#allocation4 + $0x2b0] ss:$8 sps:$4 sm:$0xff]  }
 0x20a   :  { %2585 = vmatprep.mubr.bf16.mxu0 %v990_v24  ;;  %v992_v30 = vpack.c.bf16 %v921_v26, %v921_v26  ;;  %v996_v38 = vpack.c.bf16 %v922_v29, %v922_v29  ;;  %v3798_v24 = vld [vmem:[#allocation4 + $0x3b0] ss:$8 sps:$4 sm:$0xff]   ;;  %v3801_v26 = vld [vmem:[#allocation4 + $0x2a0] ss:$8 sps:$4 sm:$0xff]  }
 0x20b   :  { %2586 = vmatmul.mubr.bf16.vlgmr.msra.gmra.mxu0 %v989_v28  ;;  %v3809_v28 = vld [vmem:[#allocation4 + $0x294] ss:$8 sps:$4 sm:$0xff]   ;;  %v3804_v29 = vld [vmem:[#allocation4 + $0x3a0] ss:$8 sps:$4 sm:$0xff]  }
 0x20c   :  { %2636 = vmatpush1.bf16.msra.mxu0 %v3723_v25  ;;  %2626 = vmatprep.mubr.bf16.mxu1 %v992_v30  ;;  %v3806_v25 = vld [vmem:[#allocation4 + $0x3a4] ss:$8 sps:$4 sm:$0xff]   ;;  %v3812_v30 = vld [vmem:[#allocation4 + $0x394] ss:$8 sps:$4 sm:$0xff]  }
 0x20d   :  { %2667 = vmatprep.mubr.bf16.mxu0 %v994_v35  ;;  %2627 = vmatmul.mubr.bf16.vlgmr.msra.gmra.mxu1 %v991_v34  ;;  %v3810_v34 = vld [vmem:[#allocation4 + $0x390] ss:$8 sps:$4 sm:$0xff]   ;;  %v3818_v35 = vld [vmem:[#allocation4 + $0x384] ss:$8 sps:$4 sm:$0xff]  }
 0x20e   :  { %2677 = vmatpush1.bf16.msra.mxu1 %v3726_v31  ;;  %2637 = vmatprep.subr.bf16.mxu0 %v3731_v32  ;;  %v3807_v31 = vld [vmem:[#allocation4 + $0x290] ss:$8 sps:$4 sm:$0xff]   ;;  %v3815_v32 = vld [vmem:[#allocation4 + $0x284] ss:$8 sps:$4 sm:$0xff]  }
 0x20f   :  { %2708 = vmatprep.mubr.bf16.mxu1 %v996_v38  ;;  %2678 = vmatprep.subr.bf16.mxu1 %v3734_v36  ;;  %v3813_v36 = vld [vmem:[#allocation4 + $0x280] ss:$8 sps:$4 sm:$0xff]  }
 0x210   :  { %2638 = vmatpush1.bf16.msra.mxu0 %v3729_v37  ;;  %v3821_v37 = vld [vmem:[#allocation4 + $0x474] ss:$8 sps:$4 sm:$0xff]   ;;  %v3816_v38 = vld [vmem:[#allocation4 + $0x380] ss:$8 sps:$4 sm:$0xff]  }
 0x211   :  { %2639 = vmatprep.subr.bf16.mxu0 %v3737_v39  ;;  %v920_v39 = vcombine.high %v4412_v17, %v4412_v17 }
 0x212   :  { %2679 = vmatpush1.bf16.msra.mxu1 %v3732_v58  ;;  %v3824_v58 = vld [vmem:[#allocation4 + $0x574] ss:$8 sps:$4 sm:$0xff]  }
 0x213   :  { %2680 = vmatprep.subr.bf16.mxu1 %v3740_v40  ;;  %v3819_v40 = vld [vmem:[#allocation4 + $0x470] ss:$8 sps:$4 sm:$0xff]  }
 0x214   :  { %2640 = vmatpush1.bf16.msra.mxu0 %v3735_v41  ;;  %v971_v41 = vcombine.high %v4414_v19, %v4414_v19 }
 0x215   :  { %2641 = vmatprep.subr.bf16.mxu0 %v3743_v42  ;;  %v993_v42 = vpack.c.bf16 %v4412_v17, %v4412_v17  ;;  %v3828_v17 = vld [vmem:[#allocation4 + $0x560] ss:$8 sps:$4 sm:$0xff]  }
 0x216   :  { %2681 = vmatpush1.bf16.msra.mxu1 %v3738_v43  ;;  %v3827_v43 = vld [vmem:[#allocation4 + $0x464] ss:$8 sps:$4 sm:$0xff]  }
 0x217   :  { %2682 = vmatprep.subr.bf16.mxu1 %v3746_v44  ;;  %v998_v44 = vpack.c.bf16 %v4414_v19, %v4414_v19  ;;  %v3839_v19 = vld [vmem:[#allocation4 + $0x444] ss:$8 sps:$4 sm:$0xff]  }
 0x218   :  { %2642 = vmatpush1.bf16.msra.mxu0 %v3741_v45  ;;  %v3822_v45 = vld [vmem:[#allocation4 + $0x570] ss:$8 sps:$4 sm:$0xff]  }
 0x219   :  { %2643 = vmatprep.subr.bf16.mxu0 %v3749_v46  ;;  %v995_v46 = vpack.c.bf16 %v920_v39, %v920_v39  ;;  %v3905_v39 = vld [vmem:[#allocation4 + $0x494] ss:$8 sps:$4 sm:$0xff]  }
 0x21a   :  { %2683 = vmatpush1.bf16.msra.mxu1 %v3744_v1  ;;  %v3830_v1 = vld [vmem:[#allocation4 + $0x564] ss:$8 sps:$4 sm:$0xff]  }
 0x21b   :  { %2684 = vmatprep.subr.bf16.mxu1 %v3752_v47  ;;  %v1000_v47 = vpack.c.bf16 %v971_v41, %v971_v41  ;;  %v3903_v41 = vld [vmem:[#allocation4 + $0x490] ss:$8 sps:$4 sm:$0xff]  }
 0x21c   :  { %2644 = vmatpush1.bf16.msra.mxu0 %v3747_v48  ;;  %v3825_v48 = vld [vmem:[#allocation4 + $0x460] ss:$8 sps:$4 sm:$0xff]  }
 0x21d   :  { %2645 = vmatprep.subr.bf16.mxu0 %v3755_v49  ;;  %v3833_v49 = vld [vmem:[#allocation4 + $0x454] ss:$8 sps:$4 sm:$0xff]  }
 0x21e   :  { %2685 = vmatpush1.bf16.msra.mxu1 %v3750_v50  ;;  %v3836_v50 = vld [vmem:[#allocation4 + $0x554] ss:$8 sps:$4 sm:$0xff]  }
 0x21f   :  { %2686 = vmatprep.subr.bf16.mxu1 %v3758_v51  ;;  %v3831_v51 = vld [vmem:[#allocation4 + $0x450] ss:$8 sps:$4 sm:$0xff]  }
 0x220   :  { %2646 = vmatpush1.bf16.msra.mxu0 %v3753_v52  ;;  %v3834_v52 = vld [vmem:[#allocation4 + $0x550] ss:$8 sps:$4 sm:$0xff]  }
 0x221   :  { %2647 = vmatprep.subr.bf16.mxu0 %v3761_v53  ;;  %v3842_v53 = vld [vmem:[#allocation4 + $0x544] ss:$8 sps:$4 sm:$0xff]  }
 0x222   :  { %2687 = vmatpush1.bf16.msra.mxu1 %v3756_v54  ;;  %v3837_v54 = vld [vmem:[#allocation4 + $0x440] ss:$8 sps:$4 sm:$0xff]  }
 0x223   :  { %2688 = vmatprep.subr.bf16.mxu1 %v3764_v55  ;;  %v3845_v55 = vld [vmem:[#allocation4 + $0x434] ss:$8 sps:$4 sm:$0xff]  }
 0x224   :  { %2648 = vmatpush1.bf16.msra.mxu0 %v3759_v56  ;;  %v3840_v56 = vld [vmem:[#allocation4 + $0x540] ss:$8 sps:$4 sm:$0xff]  }
 0x225   :  { %2649 = vmatprep.subr.bf16.mxu0 %v3767_v57  ;;  %v3848_v57 = vld [vmem:[#allocation4 + $0x534] ss:$8 sps:$4 sm:$0xff]  }
 0x226   :  { %2689 = vmatpush1.bf16.msra.mxu1 %v3762_v59  ;;  %v3843_v59 = vld [vmem:[#allocation4 + $0x430] ss:$8 sps:$4 sm:$0xff]  }
 0x227   :  { %2690 = vmatprep.subr.bf16.mxu1 %v3770_v60  ;;  %v3851_v60 = vld [vmem:[#allocation4 + $0x424] ss:$8 sps:$4 sm:$0xff]  }
 0x228   :  { %2650 = vmatpush1.bf16.msra.mxu0 %v3765_v61  ;;  %v3846_v61 = vld [vmem:[#allocation4 + $0x530] ss:$8 sps:$4 sm:$0xff]  }
 0x229   :  { %2651 = vmatprep.subr.bf16.mxu0 %v3773_v62  ;;  %v3854_v62 = vld [vmem:[#allocation4 + $0x524] ss:$8 sps:$4 sm:$0xff]  }
 0x22a   :  { %2691 = vmatpush1.bf16.msra.mxu1 %v3768_v63  ;;  %v3849_v63 = vld [vmem:[#allocation4 + $0x420] ss:$8 sps:$4 sm:$0xff]  }
 0x22b   :  { %2692 = vmatprep.subr.bf16.mxu1 %v3776_v0  ;;  %v3857_v0 = vld [vmem:[#allocation4 + $0x414] ss:$8 sps:$4 sm:$0xff]  }
 0x22c   :  { %2652 = vmatpush2.bf16.msra.mxu0 %v3771_v2  ;;  %v3852_v2 = vld [vmem:[#allocation4 + $0x520] ss:$8 sps:$4 sm:$0xff]  }
 0x22d   :  { %2653 = vmatprep.subr.bf16.mxu0 %v3779_v3  ;;  %v3860_v3 = vld [vmem:[#allocation4 + $0x514] ss:$8 sps:$4 sm:$0xff]  }
 0x22e   :  { %2693 = vmatpush2.bf16.msra.mxu1 %v3774_v4  ;;  %v3855_v4 = vld [vmem:[#allocation4 + $0x410] ss:$8 sps:$4 sm:$0xff]  }
 0x22f   :  { %2694 = vmatprep.subr.bf16.mxu1 %v3782_v27  ;;  %v3863_v27 = vld [vmem:[#allocation4 + $0x404] ss:$8 sps:$4 sm:$0xff]  }
 0x230   :  { %2654 = vmatpush2.bf16.msra.mxu0 %v3777_v5  ;;  %v3858_v5 = vld [vmem:[#allocation4 + $0x510] ss:$8 sps:$4 sm:$0xff]  }
 0x231   :  { %2655 = vmatprep.subr.bf16.mxu0 %v3785_v6  ;;  %v3866_v6 = vld [vmem:[#allocation4 + $0x504] ss:$8 sps:$4 sm:$0xff]  }
 0x232   :  { %2695 = vmatpush2.bf16.msra.mxu1 %v3780_v8  ;;  %v3861_v8 = vld [vmem:[#allocation4 + $0x400] ss:$8 sps:$4 sm:$0xff]  }
 0x233   :  { %2696 = vmatprep.subr.bf16.mxu1 %v3788_v9  ;;  %v3869_v9 = vld [vmem:[#allocation4 + $0x4f4] ss:$8 sps:$4 sm:$0xff]  }
 0x234   :  { %2656 = vmatpush2.bf16.msra.mxu0 %v3783_v12  ;;  %v3864_v12 = vld [vmem:[#allocation4 + $0x500] ss:$8 sps:$4 sm:$0xff]  }
 0x235   :  { %2657 = vmatprep.subr.bf16.mxu0 %v3791_v13  ;;  %v3872_v13 = vld [vmem:[#allocation4 + $0x5f4] ss:$8 sps:$4 sm:$0xff]  }
 0x236   :  { %2697 = vmatpush2.bf16.msra.mxu1 %v3786_v14  ;;  %v3867_v14 = vld [vmem:[#allocation4 + $0x4f0] ss:$8 sps:$4 sm:$0xff]  }
 0x237   :  { %2698 = vmatprep.subr.bf16.mxu1 %v3794_v15  ;;  %v3875_v15 = vld [vmem:[#allocation4 + $0x4e4] ss:$8 sps:$4 sm:$0xff]  }
 0x238   :  { %2658 = vmatpush2.bf16.msra.mxu0 %v3789_v16  ;;  %v3870_v16 = vld [vmem:[#allocation4 + $0x5f0] ss:$8 sps:$4 sm:$0xff]  }
 0x239   :  { %2659 = vmatprep.subr.bf16.mxu0 %v3797_v33  ;;  %v3878_v33 = vld [vmem:[#allocation4 + $0x5e4] ss:$8 sps:$4 sm:$0xff]  }
 0x23a   :  { %2699 = vmatpush2.bf16.msra.mxu1 %v3792_v18  ;;  %v3873_v18 = vld [vmem:[#allocation4 + $0x4e0] ss:$8 sps:$4 sm:$0xff]  }
 0x23b   :  { %2700 = vmatprep.subr.bf16.mxu1 %v3800_v21  ;;  %v3881_v21 = vld [vmem:[#allocation4 + $0x4d4] ss:$8 sps:$4 sm:$0xff]  }
 0x23c   :  { %2660 = vmatpush2.bf16.msra.mxu0 %v3795_v22  ;;  %v3876_v22 = vld [vmem:[#allocation4 + $0x5e0] ss:$8 sps:$4 sm:$0xff]  }
 0x23d   :  { %2661 = vmatprep.subr.bf16.mxu0 %v3803_v23  ;;  %v3884_v23 = vld [vmem:[#allocation4 + $0x5d4] ss:$8 sps:$4 sm:$0xff]  }
 0x23e   :  { %2701 = vmatpush2.bf16.msra.mxu1 %v3798_v24  ;;  %v3879_v24 = vld [vmem:[#allocation4 + $0x4d0] ss:$8 sps:$4 sm:$0xff]  }
 0x23f   :  { %2702 = vmatprep.subr.bf16.mxu1 %v3806_v25  ;;  %v3887_v25 = vld [vmem:[#allocation4 + $0x4c4] ss:$8 sps:$4 sm:$0xff]  }
 0x240   :  { %2662 = vmatpush2.bf16.msra.mxu0 %v3801_v26  ;;  %v3882_v26 = vld [vmem:[#allocation4 + $0x5d0] ss:$8 sps:$4 sm:$0xff]  }
 0x241   :  { %2663 = vmatprep.subr.bf16.mxu0 %v3809_v28  ;;  %v3890_v28 = vld [vmem:[#allocation4 + $0x5c4] ss:$8 sps:$4 sm:$0xff]  }
 0x242   :  { %2703 = vmatpush2.bf16.msra.mxu1 %v3804_v29  ;;  %v3885_v29 = vld [vmem:[#allocation4 + $0x4c0] ss:$8 sps:$4 sm:$0xff]  }
 0x243   :  { %2704 = vmatprep.subr.bf16.mxu1 %v3812_v30  ;;  %v3893_v30 = vld [vmem:[#allocation4 + $0x4b4] ss:$8 sps:$4 sm:$0xff]  }
 0x244   :  { %2664 = vmatpush2.bf16.msra.mxu0 %v3807_v31  ;;  %v3888_v31 = vld [vmem:[#allocation4 + $0x5c0] ss:$8 sps:$4 sm:$0xff]  }
 0x245   :  { %2665 = vmatprep.subr.bf16.mxu0 %v3815_v32  ;;  %v3896_v32 = vld [vmem:[#allocation4 + $0x5b4] ss:$8 sps:$4 sm:$0xff]  }
 0x246   :  { %2705 = vmatpush2.bf16.msra.mxu1 %v3810_v34  ;;  %v3891_v34 = vld [vmem:[#allocation4 + $0x4b0] ss:$8 sps:$4 sm:$0xff]  }
 0x247   :  { %2706 = vmatprep.subr.bf16.mxu1 %v3818_v35  ;;  %v3899_v35 = vld [vmem:[#allocation4 + $0x4a4] ss:$8 sps:$4 sm:$0xff]  }
 0x248   :  { %2666 = vmatpush2.bf16.msra.mxu0 %v3813_v36  ;;  %v3894_v36 = vld [vmem:[#allocation4 + $0x5b0] ss:$8 sps:$4 sm:$0xff]  }
 0x249   :  { %2717 = vmatprep.subr.bf16.mxu0 %v3821_v37  ;;  %v3902_v37 = vld [vmem:[#allocation4 + $0x5a4] ss:$8 sps:$4 sm:$0xff]  }
 0x24a   :  { %2707 = vmatpush2.bf16.msra.mxu1 %v3816_v38  ;;  %v3897_v38 = vld [vmem:[#allocation4 + $0x4a0] ss:$8 sps:$4 sm:$0xff]  }
 0x24b   :  { %2668 = vmatmul.mubr.bf16.vlgmr.msra.gmra.mxu0 %v993_v42  ;;  %2758 = vmatprep.subr.bf16.mxu1 %v3824_v58  ;;  %v3900_v58 = vld [vmem:[#allocation4 + $0x5a0] ss:$8 sps:$4 sm:$0xff]   ;;  %v3911_v42 = vld [vmem:[#allocation4 + $0x484] ss:$8 sps:$4 sm:$0xff]  }
 0x24c   :  { %2718 = vmatpush1.bf16.msra.mxu0 %v3819_v40  ;;  %2749 = vmatprep.mubr.bf16.mxu0 %v998_v44  ;;  %v3908_v40 = vld [vmem:[#allocation4 + $0x594] ss:$8 sps:$4 sm:$0xff]   ;;  %v3914_v44 = vld [vmem:[#allocation4 + $0x584] ss:$8 sps:$4 sm:$0xff]  }
 0x24d   :  { %2709 = vmatmul.mubr.bf16.vlgmr.msra.gmra.mxu1 %v995_v46  ;;  %2719 = vmatprep.subr.bf16.mxu0 %v3827_v43  ;;  %v3906_v43 = vld [vmem:[#allocation4 + $0x590] ss:$8 sps:$4 sm:$0xff]   ;;  %v3917_v46 = vld [vmem:[#allocation4 + $0x674] ss:$8 sps:$4 sm:$0xff]  }
 0x24e   :  { %2759 = vmatpush1.bf16.msra.mxu1 %v3822_v45  ;;  %2790 = vmatprep.mubr.bf16.mxu1 %v1000_v47  ;;  %v3909_v45 = vld [vmem:[#allocation4 + $0x480] ss:$8 sps:$4 sm:$0xff]   ;;  %v969_v47 = vcombine.high %v4408_v10, %v4408_v10 }
 0x24f   :  { %2760 = vmatprep.subr.bf16.mxu1 %v3830_v1  ;;  %v3912_v1 = vld [vmem:[#allocation4 + $0x580] ss:$8 sps:$4 sm:$0xff]  }
 0x250   :  { %2720 = vmatpush1.bf16.msra.mxu0 %v3825_v48  ;;  %v3920_v48 = vld [vmem:[#allocation4 + $0x774] ss:$8 sps:$4 sm:$0xff]  }
 0x251   :  { %2721 = vmatprep.subr.bf16.mxu0 %v3833_v49  ;;  %v3915_v49 = vld [vmem:[#allocation4 + $0x670] ss:$8 sps:$4 sm:$0xff]  }
 0x252   :  { %2761 = vmatpush1.bf16.msra.mxu1 %v3828_v17  ;;  %v972_v17 = vcombine.high %v4416_v20, %v4416_v20 }
 0x253   :  { %2762 = vmatprep.subr.bf16.mxu1 %v3836_v50  ;;  %v997_v50 = vpack.c.bf16 %v4408_v10, %v4408_v10  ;;  %v3924_v10 = vld [vmem:[#allocation4 + $0x760] ss:$8 sps:$4 sm:$0xff]  }
 0x254   :  { %2722 = vmatpush1.bf16.msra.mxu0 %v3831_v51  ;;  %v3923_v51 = vld [vmem:[#allocation4 + $0x664] ss:$8 sps:$4 sm:$0xff]  }
 0x255   :  { %2723 = vmatprep.subr.bf16.mxu0 %v3839_v19  ;;  %v1002_v19 = vpack.c.bf16 %v4416_v20, %v4416_v20  ;;  %v3935_v20 = vld [vmem:[#allocation4 + $0x644] ss:$8 sps:$4 sm:$0xff]  }
 0x256   :  { %2763 = vmatpush1.bf16.msra.mxu1 %v3834_v52  ;;  %v3918_v52 = vld [vmem:[#allocation4 + $0x770] ss:$8 sps:$4 sm:$0xff]  }
 0x257   :  { %2764 = vmatprep.subr.bf16.mxu1 %v3842_v53  ;;  %v999_v53 = vpack.c.bf16 %v969_v47, %v969_v47  ;;  %v4004_v47 = vld [vmem:[#allocation4 + $0x794] ss:$8 sps:$4 sm:$0xff]  }
 0x258   :  { %2724 = vmatpush1.bf16.msra.mxu0 %v3837_v54  ;;  %v3926_v54 = vld [vmem:[#allocation4 + $0x764] ss:$8 sps:$4 sm:$0xff]  }
 0x259   :  { %2725 = vmatprep.subr.bf16.mxu0 %v3845_v55  ;;  %v1004_v55 = vpack.c.bf16 %v972_v17, %v972_v17  ;;  %v4002_v17 = vld [vmem:[#allocation4 + $0x790] ss:$8 sps:$4 sm:$0xff]  }
 0x25a   :  { %2765 = vmatpush1.bf16.msra.mxu1 %v3840_v56  ;;  %v3921_v56 = vld [vmem:[#allocation4 + $0x660] ss:$8 sps:$4 sm:$0xff]  }
 0x25b   :  { %2766 = vmatprep.subr.bf16.mxu1 %v3848_v57  ;;  %v3929_v57 = vld [vmem:[#allocation4 + $0x654] ss:$8 sps:$4 sm:$0xff]  }
 0x25c   :  { %2726 = vmatpush1.bf16.msra.mxu0 %v3843_v59  ;;  %v3932_v59 = vld [vmem:[#allocation4 + $0x754] ss:$8 sps:$4 sm:$0xff]  }
 0x25d   :  { %2727 = vmatprep.subr.bf16.mxu0 %v3851_v60  ;;  %v3927_v60 = vld [vmem:[#allocation4 + $0x650] ss:$8 sps:$4 sm:$0xff]  }
 0x25e   :  { %2767 = vmatpush1.bf16.msra.mxu1 %v3846_v61  ;;  %v3930_v61 = vld [vmem:[#allocation4 + $0x750] ss:$8 sps:$4 sm:$0xff]  }
 0x25f   :  { %2768 = vmatprep.subr.bf16.mxu1 %v3854_v62  ;;  %v3938_v62 = vld [vmem:[#allocation4 + $0x744] ss:$8 sps:$4 sm:$0xff]  }
 0x260   :  { %2728 = vmatpush1.bf16.msra.mxu0 %v3849_v63  ;;  %v3933_v63 = vld [vmem:[#allocation4 + $0x640] ss:$8 sps:$4 sm:$0xff]  }
 0x261   :  { %2729 = vmatprep.subr.bf16.mxu0 %v3857_v0  ;;  %v3941_v0 = vld [vmem:[#allocation4 + $0x634] ss:$8 sps:$4 sm:$0xff]  }
 0x262   :  { %2769 = vmatpush1.bf16.msra.mxu1 %v3852_v2  ;;  %v3936_v2 = vld [vmem:[#allocation4 + $0x740] ss:$8 sps:$4 sm:$0xff]  }
 0x263   :  { %2770 = vmatprep.subr.bf16.mxu1 %v3860_v3  ;;  %v3944_v3 = vld [vmem:[#allocation4 + $0x734] ss:$8 sps:$4 sm:$0xff]  }
 0x264   :  { %2730 = vmatpush1.bf16.msra.mxu0 %v3855_v4  ;;  %v3939_v4 = vld [vmem:[#allocation4 + $0x630] ss:$8 sps:$4 sm:$0xff]  }
 0x265   :  { %2731 = vmatprep.subr.bf16.mxu0 %v3863_v27  ;;  %v3947_v27 = vld [vmem:[#allocation4 + $0x624] ss:$8 sps:$4 sm:$0xff]  }
 0x266   :  { %2771 = vmatpush1.bf16.msra.mxu1 %v3858_v5  ;;  %v3942_v5 = vld [vmem:[#allocation4 + $0x730] ss:$8 sps:$4 sm:$0xff]  }
 0x267   :  { %2772 = vmatprep.subr.bf16.mxu1 %v3866_v6  ;;  %v3950_v6 = vld [vmem:[#allocation4 + $0x724] ss:$8 sps:$4 sm:$0xff]  }
 0x268   :  { %2732 = vmatpush1.bf16.msra.mxu0 %v3861_v8  ;;  %v3945_v8 = vld [vmem:[#allocation4 + $0x620] ss:$8 sps:$4 sm:$0xff]  }
 0x269   :  { %2733 = vmatprep.subr.bf16.mxu0 %v3869_v9  ;;  %v3953_v9 = vld [vmem:[#allocation4 + $0x614] ss:$8 sps:$4 sm:$0xff]  }
 0x26a   :  { %2773 = vmatpush1.bf16.msra.mxu1 %v3864_v12  ;;  %v3948_v12 = vld [vmem:[#allocation4 + $0x720] ss:$8 sps:$4 sm:$0xff]  }
 0x26b   :  { %2774 = vmatprep.subr.bf16.mxu1 %v3872_v13  ;;  %v3956_v13 = vld [vmem:[#allocation4 + $0x714] ss:$8 sps:$4 sm:$0xff]  }
 0x26c   :  { %2734 = vmatpush2.bf16.msra.mxu0 %v3867_v14  ;;  %v3951_v14 = vld [vmem:[#allocation4 + $0x610] ss:$8 sps:$4 sm:$0xff]  }
 0x26d   :  { %2735 = vmatprep.subr.bf16.mxu0 %v3875_v15  ;;  %v3959_v15 = vld [vmem:[#allocation4 + $0x604] ss:$8 sps:$4 sm:$0xff]  }
 0x26e   :  { %2775 = vmatpush2.bf16.msra.mxu1 %v3870_v16  ;;  %v3954_v16 = vld [vmem:[#allocation4 + $0x710] ss:$8 sps:$4 sm:$0xff]  }
 0x26f   :  { %2776 = vmatprep.subr.bf16.mxu1 %v3878_v33  ;;  %v3962_v33 = vld [vmem:[#allocation4 + $0x704] ss:$8 sps:$4 sm:$0xff]  }
 0x270   :  { %2736 = vmatpush2.bf16.msra.mxu0 %v3873_v18  ;;  %v3957_v18 = vld [vmem:[#allocation4 + $0x600] ss:$8 sps:$4 sm:$0xff]  }
 0x271   :  { %2737 = vmatprep.subr.bf16.mxu0 %v3881_v21  ;;  %v3965_v21 = vld [vmem:[#allocation4 + $0x6f4] ss:$8 sps:$4 sm:$0xff]  }
 0x272   :  { %2777 = vmatpush2.bf16.msra.mxu1 %v3876_v22  ;;  %v3960_v22 = vld [vmem:[#allocation4 + $0x700] ss:$8 sps:$4 sm:$0xff]  }
 0x273   :  { %2778 = vmatprep.subr.bf16.mxu1 %v3884_v23  ;;  %v3968_v23 = vld [vmem:[#allocation4 + $0x7f4] ss:$8 sps:$4 sm:$0xff]  }
 0x274   :  { %2738 = vmatpush2.bf16.msra.mxu0 %v3879_v24  ;;  %v3963_v24 = vld [vmem:[#allocation4 + $0x6f0] ss:$8 sps:$4 sm:$0xff]  }
 0x275   :  { %2739 = vmatprep.subr.bf16.mxu0 %v3887_v25  ;;  %v3971_v25 = vld [vmem:[#allocation4 + $0x6e4] ss:$8 sps:$4 sm:$0xff]  }
 0x276   :  { %2779 = vmatpush2.bf16.msra.mxu1 %v3882_v26  ;;  %v3966_v26 = vld [vmem:[#allocation4 + $0x7f0] ss:$8 sps:$4 sm:$0xff]  }
 0x277   :  { %2780 = vmatprep.subr.bf16.mxu1 %v3890_v28  ;;  %v3974_v28 = vld [vmem:[#allocation4 + $0x7e4] ss:$8 sps:$4 sm:$0xff]  }
 0x278   :  { %2740 = vmatpush2.bf16.msra.mxu0 %v3885_v29  ;;  %v3969_v29 = vld [vmem:[#allocation4 + $0x6e0] ss:$8 sps:$4 sm:$0xff]  }
 0x279   :  { %2741 = vmatprep.subr.bf16.mxu0 %v3893_v30  ;;  %v3977_v30 = vld [vmem:[#allocation4 + $0x6d4] ss:$8 sps:$4 sm:$0xff]  }
 0x27a   :  { %2781 = vmatpush2.bf16.msra.mxu1 %v3888_v31  ;;  %v3972_v31 = vld [vmem:[#allocation4 + $0x7e0] ss:$8 sps:$4 sm:$0xff]  }
 0x27b   :  { %2782 = vmatprep.subr.bf16.mxu1 %v3896_v32  ;;  %v3980_v32 = vld [vmem:[#allocation4 + $0x7d4] ss:$8 sps:$4 sm:$0xff]  }
 0x27c   :  { %2742 = vmatpush2.bf16.msra.mxu0 %v3891_v34  ;;  %v3975_v34 = vld [vmem:[#allocation4 + $0x6d0] ss:$8 sps:$4 sm:$0xff]  }
 0x27d   :  { %2743 = vmatprep.subr.bf16.mxu0 %v3899_v35  ;;  %v3983_v35 = vld [vmem:[#allocation4 + $0x6c4] ss:$8 sps:$4 sm:$0xff]  }
 0x27e   :  { %2783 = vmatpush2.bf16.msra.mxu1 %v3894_v36  ;;  %v3978_v36 = vld [vmem:[#allocation4 + $0x7d0] ss:$8 sps:$4 sm:$0xff]  }
 0x27f   :  { %2784 = vmatprep.subr.bf16.mxu1 %v3902_v37  ;;  %v3986_v37 = vld [vmem:[#allocation4 + $0x7c4] ss:$8 sps:$4 sm:$0xff]  }
 0x280   :  { %2744 = vmatpush2.bf16.msra.mxu0 %v3897_v38  ;;  %v3981_v38 = vld [vmem:[#allocation4 + $0x6c0] ss:$8 sps:$4 sm:$0xff]  }
 0x281   :  { %2745 = vmatprep.subr.bf16.mxu0 %v3905_v39  ;;  %v3989_v39 = vld [vmem:[#allocation4 + $0x6b4] ss:$8 sps:$4 sm:$0xff]  }
 0x282   :  { %2785 = vmatpush2.bf16.msra.mxu1 %v3900_v58  ;;  %v3984_v58 = vld [vmem:[#allocation4 + $0x7c0] ss:$8 sps:$4 sm:$0xff]  }
 0x283   :  { %2786 = vmatprep.subr.bf16.mxu1 %v3908_v40  ;;  %v3992_v40 = vld [vmem:[#allocation4 + $0x7b4] ss:$8 sps:$4 sm:$0xff]  }
 0x284   :  { %2746 = vmatpush2.bf16.msra.mxu0 %v3903_v41  ;;  %v3987_v41 = vld [vmem:[#allocation4 + $0x6b0] ss:$8 sps:$4 sm:$0xff]  }
 0x285   :  { %2747 = vmatprep.subr.bf16.mxu0 %v3911_v42  ;;  %v3995_v42 = vld [vmem:[#allocation4 + $0x6a4] ss:$8 sps:$4 sm:$0xff]  }
 0x286   :  { %2787 = vmatpush2.bf16.msra.mxu1 %v3906_v43  ;;  %v3990_v43 = vld [vmem:[#allocation4 + $0x7b0] ss:$8 sps:$4 sm:$0xff]  }
 0x287   :  { %2788 = vmatprep.subr.bf16.mxu1 %v3914_v44  ;;  %v3998_v44 = vld [vmem:[#allocation4 + $0x7a4] ss:$8 sps:$4 sm:$0xff]  }
 0x288   :  { %2748 = vmatpush2.bf16.msra.mxu0 %v3909_v45  ;;  %v3993_v45 = vld [vmem:[#allocation4 + $0x6a0] ss:$8 sps:$4 sm:$0xff]  }
 0x289   :  { %2799 = vmatprep.subr.bf16.mxu0 %v3917_v46  ;;  %v4001_v46 = vld [vmem:[#allocation4 + $0x694] ss:$8 sps:$4 sm:$0xff]  }
 0x28a   :  { %2789 = vmatpush2.bf16.msra.mxu1 %v3912_v1  ;;  %v3996_v1 = vld [vmem:[#allocation4 + $0x7a0] ss:$8 sps:$4 sm:$0xff]  }
 0x28b   :  { %2750 = vmatmul.mubr.bf16.vlgmr.msra.gmra.mxu0 %v997_v50  ;;  %2840 = vmatprep.subr.bf16.mxu1 %v3920_v48  ;;  %v3999_v48 = vld [vmem:[#allocation4 + $0x690] ss:$8 sps:$4 sm:$0xff]   ;;  %v4010_v50 = vld [vmem:[#allocation4 + $0x784] ss:$8 sps:$4 sm:$0xff]  }
 0x28c   :  { %2800 = vmatpush1.bf16.msra.mxu0 %v3915_v49  ;;  %2831 = vmatprep.mubr.bf16.mxu0 %v1002_v19  ;;  %v4007_v49 = vld [vmem:[#allocation4 + $0x684] ss:$8 sps:$4 sm:$0xff]   ;;  %v1265_v19 = vsub.s32 0, %v4140_v7 }
 0x28d   :  { %2791 = vmatmul.mubr.bf16.vlgmr.msra.gmra.mxu1 %v999_v53  ;;  %2801 = vmatprep.subr.bf16.mxu0 %v3923_v51  ;;  %v4005_v51 = vld [vmem:[#allocation4 + $0x680] ss:$8 sps:$4 sm:$0xff]  }
 0x28e   :  { %2841 = vmatpush1.bf16.msra.mxu1 %v3918_v52  ;;  %2872 = vmatprep.mubr.bf16.mxu1 %v1004_v55  ;;  %v1261_v52 = vld [vmem:[%s4455_s6] sm:$0x3]  ;;  %v970_v55 = vcombine.high %v4410_v11, %v4410_v11 }
 0x28f   :  { %2842 = vmatprep.subr.bf16.mxu1 %v3926_v54  ;;  %v4008_v53 = vld [vmem:[#allocation4 + $0x780] ss:$8 sps:$4 sm:$0xff]   ;;  %v1269_v54 = vsub.s32 1, %v4140_v7 }
 0x290   :  { %2802 = vmatpush1.bf16.msra.mxu0 %v3921_v56  ;;  %v1266_v56 = vrot.slane %v1261_v52, %v1265_v19  ;;  %v2883_v19 = vld [vmem:[#allocation6] sm:$0xff] }
 0x291   :  { %2803 = vmatprep.subr.bf16.mxu0 %v3929_v57  ;;  %v1001_v57 = vpack.c.bf16 %v4410_v11, %v4410_v11  ;;  %v2913_v11 = vld [vmem:[#allocation6 + $0xf0] sm:$0xff] }
 0x292   :  { %2843 = vmatpush1.bf16.msra.mxu1 %v3924_v10  ;;  %v1270_v10 = vrot.slane %v1261_v52, %v1269_v54 }
 0x293   :  { %2844 = vmatprep.subr.bf16.mxu1 %v3932_v59 }
 0x294   :  { %2804 = vmatpush1.bf16.msra.mxu0 %v3927_v60  ;;  %v1003_v60 = vpack.c.bf16 %v970_v55, %v970_v55 }
 0x295   :  { %2805 = vmatprep.subr.bf16.mxu0 %v3935_v20 }
 0x296   :  { %2845 = vmatpush1.bf16.msra.mxu1 %v3930_v61 }
 0x297   :  { %2846 = vmatprep.subr.bf16.mxu1 %v3938_v62 }
 0x298   :  { %2806 = vmatpush1.bf16.msra.mxu0 %v3933_v63 }
 0x299   :  { %2807 = vmatprep.subr.bf16.mxu0 %v3941_v0 }
 0x29a   :  { %2847 = vmatpush1.bf16.msra.mxu1 %v3936_v2 }
 0x29b   :  { %2848 = vmatprep.subr.bf16.mxu1 %v3944_v3 }
 0x29c   :  { %2808 = vmatpush1.bf16.msra.mxu0 %v3939_v4 }
 0x29d   :  { %2809 = vmatprep.subr.bf16.mxu0 %v3947_v27 }
 0x29e   :  { %2849 = vmatpush1.bf16.msra.mxu1 %v3942_v5 }
 0x29f   :  { %2850 = vmatprep.subr.bf16.mxu1 %v3950_v6  ;;  %v2914_v6 = vld [vmem:[#allocation6 + $0xf8] sm:$0xff] }
 0x2a0   :  { %2810 = vmatpush1.bf16.msra.mxu0 %v3945_v8  ;;  %v2898_v8 = vld [vmem:[#allocation6 + $0x78] sm:$0xff] }
 0x2a1   :  { %2811 = vmatprep.subr.bf16.mxu0 %v3953_v9  ;;  %v2897_v9 = vld [vmem:[#allocation6 + $0x70] sm:$0xff] }
 0x2a2   :  { %2851 = vmatpush1.bf16.msra.mxu1 %v3948_v12  ;;  %v2912_v12 = vld [vmem:[#allocation6 + $0xe8] sm:$0xff] }
 0x2a3   :  { %2852 = vmatprep.subr.bf16.mxu1 %v3956_v13  ;;  %v2896_v13 = vld [vmem:[#allocation6 + $0x68] sm:$0xff] }
 0x2a4   :  { %2812 = vmatpush1.bf16.msra.mxu0 %v3951_v14  ;;  %v2911_v14 = vld [vmem:[#allocation6 + $0xe0] sm:$0xff] }
 0x2a5   :  { %2813 = vmatprep.subr.bf16.mxu0 %v3959_v15  ;;  %v2895_v15 = vld [vmem:[#allocation6 + $0x60] sm:$0xff] }
 0x2a6   :  { %2853 = vmatpush1.bf16.msra.mxu1 %v3954_v16  ;;  %v2910_v16 = vld [vmem:[#allocation6 + $0xd8] sm:$0xff] }
 0x2a7   :  { %2854 = vmatprep.subr.bf16.mxu1 %v3962_v33  ;;  %v2894_v33 = vld [vmem:[#allocation6 + $0x58] sm:$0xff] }
 0x2a8   :  { %2814 = vmatpush1.bf16.msra.mxu0 %v3957_v18  ;;  %v2909_v18 = vld [vmem:[#allocation6 + $0xd0] sm:$0xff] }
 0x2a9   :  { %2815 = vmatprep.subr.bf16.mxu0 %v3965_v21  ;;  %v2893_v21 = vld [vmem:[#allocation6 + $0x50] sm:$0xff] }
 0x2aa   :  { %2855 = vmatpush1.bf16.msra.mxu1 %v3960_v22  ;;  %v2908_v22 = vld [vmem:[#allocation6 + $0xc8] sm:$0xff] }
 0x2ab   :  { %2856 = vmatprep.subr.bf16.mxu1 %v3968_v23  ;;  %v2892_v23 = vld [vmem:[#allocation6 + $0x48] sm:$0xff] }
 0x2ac   :  { %2816 = vmatpush2.bf16.msra.mxu0 %v3963_v24  ;;  %v2907_v24 = vld [vmem:[#allocation6 + $0xc0] sm:$0xff] }
 0x2ad   :  { %2817 = vmatprep.subr.bf16.mxu0 %v3971_v25  ;;  %v2891_v25 = vld [vmem:[#allocation6 + $0x40] sm:$0xff] }
 0x2ae   :  { %2857 = vmatpush2.bf16.msra.mxu1 %v3966_v26  ;;  %v2906_v26 = vld [vmem:[#allocation6 + $0xb8] sm:$0xff] }
 0x2af   :  { %2858 = vmatprep.subr.bf16.mxu1 %v3974_v28  ;;  %v2890_v28 = vld [vmem:[#allocation6 + $0x38] sm:$0xff] }
 0x2b0   :  { %2818 = vmatpush2.bf16.msra.mxu0 %v3969_v29  ;;  %v2905_v29 = vld [vmem:[#allocation6 + $0xb0] sm:$0xff] }
 0x2b1   :  { %2819 = vmatprep.subr.bf16.mxu0 %v3977_v30  ;;  %v2889_v30 = vld [vmem:[#allocation6 + $0x30] sm:$0xff] }
 0x2b2   :  { %2859 = vmatpush2.bf16.msra.mxu1 %v3972_v31  ;;  %v2904_v31 = vld [vmem:[#allocation6 + $0xa8] sm:$0xff] }
 0x2b3   :  { %2860 = vmatprep.subr.bf16.mxu1 %v3980_v32  ;;  %v2888_v32 = vld [vmem:[#allocation6 + $0x28] sm:$0xff] }
 0x2b4   :  { %2820 = vmatpush2.bf16.msra.mxu0 %v3975_v34 }
 0x2b5   :  { %2821 = vmatprep.subr.bf16.mxu0 %v3983_v35 }
 0x2b6   :  { %2861 = vmatpush2.bf16.msra.mxu1 %v3978_v36  ;;  %v2903_v36 = vld [vmem:[#allocation6 + $0xa0] sm:$0xff] }
 0x2b7   :  { %2862 = vmatprep.subr.bf16.mxu1 %v3986_v37  ;;  %v2887_v37 = vld [vmem:[#allocation6 + $0x20] sm:$0xff] }
 0x2b8   :  { %2822 = vmatpush2.bf16.msra.mxu0 %v3981_v38 }
 0x2b9   :  { %2823 = vmatprep.subr.bf16.mxu0 %v3989_v39 }
 0x2ba   :  { %2863 = vmatpush2.bf16.msra.mxu1 %v3984_v58 }
 0x2bb   :  { %2864 = vmatprep.subr.bf16.mxu1 %v3992_v40 }
 0x2bc   :  { %2824 = vmatpush2.bf16.msra.mxu0 %v3987_v41 }
 0x2bd   :  { %2825 = vmatprep.subr.bf16.mxu0 %v3995_v42 }
 0x2be   :  { %2865 = vmatpush2.bf16.msra.mxu1 %v3990_v43 }
 0x2bf   :  { %2866 = vmatprep.subr.bf16.mxu1 %v3998_v44  ;;  %v2902_v44 = vld [vmem:[#allocation6 + $0x98] sm:$0xff] }
 0x2c0   :  { %2826 = vmatpush2.bf16.msra.mxu0 %v3993_v45  ;;  %v2886_v45 = vld [vmem:[#allocation6 + $0x18] sm:$0xff] }
 0x2c1   :  { %2827 = vmatprep.subr.bf16.mxu0 %v4001_v46 }
 0x2c2   :  { %2867 = vmatpush2.bf16.msra.mxu1 %v3996_v1 }
 0x2c3   :  { %2868 = vmatprep.subr.bf16.mxu1 %v4004_v47  ;;  %v2901_v47 = vld [vmem:[#allocation6 + $0x90] sm:$0xff] }
 0x2c4   :  { %2828 = vmatpush2.bf16.msra.mxu0 %v3999_v48  ;;  %v2885_v48 = vld [vmem:[#allocation6 + $0x10] sm:$0xff] }
 0x2c5   :  { %2829 = vmatprep.subr.bf16.mxu0 %v4007_v49  ;;  %v2900_v49 = vld [vmem:[#allocation6 + $0x88] sm:$0xff] }
 0x2c6   :  { %2869 = vmatpush2.bf16.msra.mxu1 %v4002_v17 }
 0x2c7   :  { %2870 = vmatprep.subr.bf16.mxu1 %v4010_v50  ;;  %v2884_v50 = vld [vmem:[#allocation6 + $0x8] sm:$0xff] }
 0x2c8   :  { %2830 = vmatpush2.bf16.msra.mxu0 %v4005_v51  ;;  %v2899_v51 = vld [vmem:[#allocation6 + $0x80] sm:$0xff] }
 0x2c9   :  { %3406 = vmatprep.subr.mxu0 %v2914_v6 }
 0x2ca   :  { %2871 = vmatpush2.bf16.msra.mxu1 %v4008_v53 }
 0x2cb   :  { %2832 = vmatmul.mubr.bf16.vlgmr.msra.gmra.mxu0 %v1001_v57  ;;  %v2587_v59 = vpop.f32.mrf.mxu0 }
 0x2cc   :  { %v2588_v20 = vadd.f32 %v2587_v59, %v1266_v56  ;;  %3407 = vmatpush3.msra.mxu0 %v2898_v8 }
 0x2cd   :  { %2873 = vmatmul.mubr.bf16.vlgmr.msra.gmra.mxu1 %v1003_v60  ;;  %v2589_v61 = vpop.f32.mrf.mxu0  ;;  %v2628_v62 = vpop.f32.mrf.mxu1  ;;  %3408 = vmatprep.subr.mxu0 %v2913_v11 }
 0x2ce   :  { %v2590_v63 = vadd.f32 %v2589_v61, %v1270_v10  ;;  %v2629_v7 = vadd.f32 %v2628_v62, %v2588_v20  ;;  %3409 = vmatpush3.msra.mxu0 %v2897_v9 }
 0x2cf   :  { %v2591_v0 = vpop.f32.mrf.mxu0  ;;  %v2630_v2 = vpop.f32.mrf.mxu1  ;;  %3410 = vmatprep.subr.mxu0 %v2912_v12 }
 0x2d0   :  { %v2631_v3 = vadd.f32 %v2630_v2, %v2590_v63  ;;  %3411 = vmatpush3.msra.mxu0 %v2896_v13 }
 0x2d1   :  { %v2592_v4 = vpop.f32.mrf.mxu0  ;;  %v2632_v27 = vpop.f32.mrf.mxu1  ;;  %3412 = vmatprep.subr.mxu0 %v2911_v14 }
 0x2d2   :  { %3413 = vmatpush3.msra.mxu0 %v2895_v15  ;;  %v3309_v15 = vld [vmem:[%s4457_s8] ss:$0 sm:$0xff] }
 0x2d3   :  { %v2633_v5 = vpop.f32.mrf.mxu1  ;;  %3414 = vmatprep.subr.mxu0 %v2910_v16 }
 0x2d4   :  { %3415 = vmatpush3.msra.mxu0 %v2894_v33 }
 0x2d5   :  { %3416 = vmatprep.subr.mxu0 %v2909_v18 }
 0x2d6   :  { %3417 = vmatpush3.msra.mxu0 %v2893_v21 }
 0x2d7   :  { %3418 = vmatprep.subr.mxu0 %v2908_v22 }
 0x2d8   :  { %3419 = vmatpush3.msra.mxu0 %v2892_v23 }
 0x2d9   :  { %3420 = vmatprep.subr.mxu0 %v2907_v24 }
 0x2da   :  { %3421 = vmatpush3.msra.mxu0 %v2891_v25 }
 0x2db   :  { %3422 = vmatprep.subr.mxu0 %v2906_v26 }
 0x2dc   :  { %3423 = vmatpush3.msra.mxu0 %v2890_v28 }
 0x2dd   :  { %3424 = vmatprep.subr.mxu0 %v2905_v29 }
 0x2de   :  { %3425 = vmatpush3.msra.mxu0 %v2889_v30 }
 0x2df   :  { %3426 = vmatprep.subr.mxu0 %v2904_v31 }
 0x2e0   :  { %3427 = vmatpush3.msra.mxu0 %v2888_v32 }
 0x2e1   :  { %3428 = vmatprep.subr.mxu0 %v2903_v36 }
 0x2e2   :  { %3429 = vmatpush3.msra.mxu0 %v2887_v37 }
 0x2e3   :  { %3430 = vmatprep.subr.mxu0 %v2902_v44 }
 0x2e4   :  { %3431 = vmatpush3.msra.mxu0 %v2886_v45 }
 0x2e5   :  { %3432 = vmatprep.subr.mxu0 %v2901_v47 }
 0x2e6   :  { %3433 = vmatpush3.msra.mxu0 %v2885_v48 }
 0x2e7   :  { %3434 = vmatprep.subr.mxu0 %v2900_v49 }
 0x2e8   :  { %3435 = vmatpush3.msra.mxu0 %v2884_v50 }
 0x2e9   :  { %3436 = vmatprep.subr.mxu0 %v2899_v51 }
 0x2ea   :  { %3437 = vmatpush3.msra.mxu0 %v2883_v19 }
 0x30b   :  { %v2669_v34 = vpop.f32.mrf.mxu0 }
 0x30c   :  { %v2670_v35 = vadd.f32 %v2669_v34, %v2629_v7 }
 0x30d   :  { %v2671_v38 = vpop.f32.mrf.mxu0  ;;  %v2710_v39 = vpop.f32.mrf.mxu1 }
 0x30e   :  { %v2672_v58 = vadd.f32 %v2671_v38, %v2631_v3  ;;  %v2711_v40 = vadd.f32 %v2710_v39, %v2670_v35 }
 0x30f   :  { %v2673_v41 = vpop.f32.mrf.mxu0  ;;  %v2712_v42 = vpop.f32.mrf.mxu1 }
 0x310   :  { %v2713_v43 = vadd.f32 %v2712_v42, %v2672_v58 }
 0x311   :  { %v2674_v46 = vpop.f32.mrf.mxu0  ;;  %v2714_v1 = vpop.f32.mrf.mxu1 }
 0x313   :  { %v2715_v17 = vpop.f32.mrf.mxu1 }
 0x34b   :  { %v2751_v52 = vpop.f32.mrf.mxu0 }
 0x34c   :  { %v2752_v60 = vadd.f32 %v2751_v52, %v2711_v40 }
 0x34d   :  { %v2753_v53 = vpop.f32.mrf.mxu0  ;;  %v2792_v54 = vpop.f32.mrf.mxu1 }
 0x34e   :  { %v2754_v20 = vadd.f32 %v2753_v53, %v2713_v43  ;;  %v2793_v61 = vadd.f32 %v2792_v54, %v2752_v60 }
 0x34f   :  { %v2755_v55 = vpop.f32.mrf.mxu0  ;;  %v2794_v56 = vpop.f32.mrf.mxu1 }
 0x350   :  { %v2795_v63 = vadd.f32 %v2794_v56, %v2754_v20 }
 0x351   :  { %v2756_v57 = vpop.f32.mrf.mxu0  ;;  %v2796_v10 = vpop.f32.mrf.mxu1 }
 0x353   :  { %v2797_v59 = vpop.f32.mrf.mxu1 }
 0x38b   :  { %v2833_v62 = vpop.f32.mrf.mxu0 }
 0x38c   :  { %v2834_v7 = vadd.f32 %v2833_v62, %v2793_v61 }
 0x38d   :  { %v2835_v0 = vpop.f32.mrf.mxu0  ;;  %v2874_v2 = vpop.f32.mrf.mxu1 }
 0x38e   :  { %v2836_v3 = vadd.f32 %v2835_v0, %v2795_v63  ;;  %v2875_v4 = vadd.f32 %v2874_v2, %v2834_v7 }
 0x38f   :  { %v2837_v27 = vpop.f32.mrf.mxu0  ;;  %v2876_v5 = vpop.f32.mrf.mxu1 }
 0x390   :  { %v2877_v6 = vadd.f32 %v2876_v5, %v2836_v3  ;;  %v2881_v12 = vmax.f32 %v2875_v4, 0.0 }
 0x391   :  { %v2838_v8 = vpop.f32.mrf.mxu0  ;;  %v2878_v11 = vpop.f32.mrf.mxu1 }
 0x392   :  { %v2882_v9 = vmax.f32 %v2877_v6, 0.0 }
 0x393   :  { %v2879_v13 = vpop.f32.mrf.mxu1 }
 0x394   :  { %2986 = vmatprep.mubr.f32.mxu0 %v2882_v9 }
 0x395   :  { %2987 = vmatmul.mubr.f32.vlgmr.msra.gmra.mxu0 %v2881_v12 }
 0x455   :  { %v3438_v14 = vpop.f32.mrf.mxu0 }
 0x457   :  { %v3439_v16 = vpop.f32.mrf.mxu0 }
 0x458   :  { %v3440_v33 = vadd.f32 %v3439_v16, %v3438_v14 }
 0x45a   :  { %v2989_v18 = vadd.f32 %v3440_v33, %v3309_v15 }
 0x45c   :  { %2992 = vst [vmem:[%s4458_s9] sm:$0x3] %v2989_v18 }
 0x45d   :  { %2997 = vsyncpa [#allocation3], 1 }
 0x45e   :  { %2998 = vsyncpa [#allocation5], 1 }

</bundles_post_ra>
